<compile_context>
chip_gen: v7x
topology: tpu7x:2x2x1
jax: 0.10.0
libtpu: 0.0.40
codegen_flags: <defaults>
</compile_context>

<pallas_src>
import functools

import jax
import jax.numpy as jnp
from jax import lax
from jax.experimental import pallas as pl
from jax.experimental.pallas import tpu as pltpu


def _round_up(n, m):
    return ((n + m - 1) // m) * m


# --------------------------------------------------------------------------------------
# Fused kernel: per time-chunk input projection + LSTM recurrence + fc epilogue
# --------------------------------------------------------------------------------------
def _lstm_fused_kernel(x_ref, w_ih_ref, b_ref, w_hh_ref, w_fc_ref, b_fc_ref,
                       out_ref, h_scr, c_scr, *, t_total, mask_tail, unroll):
    ti = pl.program_id(1)                     # time-chunk index (innermost, "arbitrary")
    TT, BB, _ = x_ref.shape
    Hp = w_hh_ref.shape[0]

    @pl.when(ti == 0)
    def _():
        h_scr[...] = jnp.zeros_like(h_scr)
        c_scr[...] = jnp.zeros_like(c_scr)

    # Hoisted (loop-invariant) bias broadcast -- don't re-broadcast every step.
    bias = jnp.broadcast_to(b_ref[...], (BB, 4 * Hp))

    def step(t, carry):
        h, c = carry
        # Fused input projection: the MXU has slack on the serial h-chain, so this small
        # independent matmul is essentially free wall-clock (and kills the xproj HBM trip).
        gates = (jnp.dot(x_ref[t], w_ih_ref[...], preferred_element_type=jnp.float32)
                 + jnp.dot(h, w_hh_ref[...], preferred_element_type=jnp.float32)
                 + bias)
        # Each gate slice is a whole 128-lane group (Hp is a multiple of 128).
        # sigmoid via tanh: one EUP op instead of exp + reciprocal (single EUP slot).
        i_g = 0.5 * jnp.tanh(0.5 * gates[:, 0 * Hp:1 * Hp]) + 0.5
        f_g = 0.5 * jnp.tanh(0.5 * gates[:, 1 * Hp:2 * Hp]) + 0.5
        g_g = jnp.tanh(gates[:, 2 * Hp:3 * Hp])
        o_g = 0.5 * jnp.tanh(0.5 * gates[:, 3 * Hp:4 * Hp]) + 0.5
        c_new = f_g * c + i_g * g_g
        h_new = o_g * jnp.tanh(c_new)
        if mask_tail:
            # Padded trailing time steps must not advance the state.
            valid = (ti * TT + t) < t_total
            h_new = jnp.where(valid, h_new, h)
            c_new = jnp.where(valid, c_new, c)
        return (h_new, c_new)

    # Bounded unroll: keeps LLO scheduling visibility without exploding code size / vregs.
    h, c = lax.fori_loop(0, TT, step, (h_scr[...], c_scr[...]), unroll=unroll)
    h_scr[...] = h
    c_scr[...] = c

    @pl.when(ti == pl.num_programs(1) - 1)
    def _():
        # Fused final linear layer; single lane-dense (BB, Op) store.
        out_ref[...] = (jnp.dot(h, w_fc_ref[...], preferred_element_type=jnp.float32)
                        + b_fc_ref[...])


# --------------------------------------------------------------------------------------
# Wrapper
# --------------------------------------------------------------------------------------
def lstm_model_forward(x, w_ih, w_hh, b, w_fc, b_fc):
    B, T, I = x.shape
    H = w_hh.shape[0]
    O = w_fc.shape[1]
    f32 = jnp.float32

    Hp = _round_up(H, 128)     # lane granularity per gate
    Op = _round_up(O, 128)     # lane-dense output store
    G = 4 * Hp

    # ---- batch tile: cap at 32 (vreg budget); >= 2 parallel tiles when possible (v7x) ----
    Bp = _round_up(B, 8)
    if Bp >= 16:
        BB = max(c for c in (8, 16, 32) if Bp % c == 0 and Bp // c >= 2)
    else:
        BB = Bp

    # ---- time tile: <= 32 steps per chunk, preferring an exact divisor (no masked tail) ----
    if T <= 32:
        TT = T
    else:
        best = (None, None)
        for c in range(8, 33):
            pad = (-T) % c
            if best[0] is None or pad < best[0] or (pad == best[0] and c > best[1]):
                best = (pad, c)
        TT = best[1]
    Tp = _round_up(T, TT)
    mask_tail = (Tp != T)

    # ---- gate-wise zero padding of the weights (exact: padded hidden units stay 0) ----
    w_ih_p = jnp.zeros((I, G), f32)
    w_hh_p = jnp.zeros((Hp, G), f32)
    b_p = jnp.zeros((1, G), f32)
    for k in range(4):
        w_ih_p = w_ih_p.at[:, k * Hp:k * Hp + H].set(w_ih[:, k * H:(k + 1) * H])
        w_hh_p = w_hh_p.at[:H, k * Hp:k * Hp + H].set(w_hh[:, k * H:(k + 1) * H])
        b_p = b_p.at[:, k * Hp:k * Hp + H].set(b[:, k * H:(k + 1) * H])
    w_fc_p = jnp.zeros((Hp, Op), f32).at[:H, :O].set(w_fc)
    b_fc_p = jnp.zeros((1, Op), f32).at[:, :O].set(b_fc)

    # ---- pad batch/time, time-major layout (Tp, Bp, I) ----
    x_p = jnp.zeros((Tp, Bp, I), f32).at[:T, :B, :].set(jnp.swapaxes(x, 0, 1))

    n_bb = Bp // BB
    n_tt = Tp // TT

    # ---- explicit VMEM budget (double-buffered x chunk + weights + out + h/c scratch) ----
    vmem_est = 4 * (2 * TT * BB * I
                    + 2 * (I * G + G + Hp * G + Hp * Op + Op)
                    + 2 * BB * Op
                    + 2 * BB * Hp)
    vmem_limit = int(min(96 * 2**20, max(4 * 2**20, vmem_est * 3 // 2 + (2 << 20))))

    kernel = functools.partial(_lstm_fused_kernel,
                               t_total=T, mask_tail=mask_tail, unroll=min(TT, 8))

    out_p = pl.pallas_call(
        kernel,
        out_shape=jax.ShapeDtypeStruct((Bp, Op), f32),
        grid_spec=pltpu.PrefetchScalarGridSpec(
            num_scalar_prefetch=0,
            grid=(n_bb, n_tt),              # time innermost so h/c carry correctly
            in_specs=[
                pl.BlockSpec((TT, BB, I), lambda bi, ti: (ti, bi, 0)),
                pl.BlockSpec((I, G), lambda bi, ti: (0, 0)),
                pl.BlockSpec((1, G), lambda bi, ti: (0, 0)),
                pl.BlockSpec((Hp, G), lambda bi, ti: (0, 0)),
                pl.BlockSpec((Hp, Op), lambda bi, ti: (0, 0)),
                pl.BlockSpec((1, Op), lambda bi, ti: (0, 0)),
            ],
            out_specs=pl.BlockSpec((BB, Op), lambda bi, ti: (bi, 0)),
            scratch_shapes=[pltpu.VMEM((BB, Hp), f32),     # h carry
                            pltpu.VMEM((BB, Hp), f32)],    # c carry
        ),
        compiler_params=pltpu.CompilerParams(
            dimension_semantics=("parallel", "arbitrary"),
            vmem_limit_bytes=vmem_limit),
    )(x_p, w_ih_p, b_p, w_hh_p, w_fc_p, b_fc_p)

    return out_p[:B, :O]


# --------------------------------------------------------------------------------------
# Pure-JAX reference matching PyTorch nn.LSTM(batch_first) + nn.Linear semantics
# --------------------------------------------------------------------------------------
def reference_forward(x, w_ih, w_hh, b, w_fc, b_fc):
    B, T, I = x.shape
    H = w_hh.shape[0]

    def step(carry, x_t):
        h, c = carry
        gates = x_t @ w_ih + h @ w_hh + b
        i_g = jax.nn.sigmoid(gates[:, 0 * H:1 * H])
        f_g = jax.nn.sigmoid(gates[:, 1 * H:2 * H])
        g_g = jnp.tanh(gates[:, 2 * H:3 * H])
        o_g = jax.nn.sigmoid(gates[:, 3 * H:4 * H])
        c = f_g * c + i_g * g_g
        h = o_g * jnp.tanh(c)
        return (h, c), None

    h0 = jnp.zeros((B, H), jnp.float32)
    c0 = jnp.zeros((B, H), jnp.float32)
    (h_last, _), _ = jax.lax.scan(step, (h0, c0), jnp.swapaxes(x, 0, 1))
    return h_last @ w_fc + b_fc


if __name__ == "__main__":
    # Small shapes consistent with the module's forward.
    batch, seq_len = 2, 8
    input_size, hidden_size, output_size = 8, 32, 4

    key = jax.random.PRNGKey(0)
    kx, k1, k2, k3, k4, k5, k6 = jax.random.split(key, 7)

    scale = 1.0 / jnp.sqrt(hidden_size).astype(jnp.float32)
    w_ih = jax.random.uniform(k1, (input_size, 4 * hidden_size), jnp.float32, -scale, scale)
    w_hh = jax.random.uniform(k2, (hidden_size, 4 * hidden_size), jnp.float32, -scale, scale)
    b_ih = jax.random.uniform(k3, (1, 4 * hidden_size), jnp.float32, -scale, scale)
    b_hh = jax.random.uniform(k4, (1, 4 * hidden_size), jnp.float32, -scale, scale)
    b = b_ih + b_hh
    w_fc = jax.random.uniform(k5, (hidden_size, output_size), jnp.float32, -scale, scale)
    b_fc = jax.random.uniform(k6, (1, output_size), jnp.float32, -scale, scale)

    x = jax.random.normal(kx, (batch, seq_len, input_size), jnp.float32)

    fwd = jax.jit(lstm_model_forward)
    out = fwd(x, w_ih, w_hh, b, w_fc, b_fc)
    out = jax.block_until_ready(out)

    ref = reference_forward(x, w_ih, w_hh, b, w_fc, b_fc)
    assert out.shape == (batch, output_size)
    assert jnp.allclose(out, ref, atol=2e-5, rtol=2e-5), (out, ref)

    print("KERNEL_OK")
</pallas_src>

<mosaic_0001>
module attributes {stable_mosaic.version = 11 : i64} {
  func.func @_lstm_fused_kernel(%arg0: i32, %arg1: i32, %arg2: memref<8x8x8xf32, #tpu.memory_space<vmem>>, %arg3: memref<8x512xf32, #tpu.memory_space<vmem>>, %arg4: memref<1x512xf32, #tpu.memory_space<vmem>>, %arg5: memref<128x512xf32, #tpu.memory_space<vmem>>, %arg6: memref<128x128xf32, #tpu.memory_space<vmem>>, %arg7: memref<1x128xf32, #tpu.memory_space<vmem>>, %arg8: memref<8x128xf32, #tpu.memory_space<vmem>>, %arg9: memref<8x128xf32, #tpu.memory_space<vmem>>, %arg10: memref<8x128xf32, #tpu.memory_space<vmem>>) attributes {dimension_semantics = [#tpu.dimension_semantics<parallel>, #tpu.dimension_semantics<arbitrary>], iteration_bounds = array<i64: 1, 1>, scalar_prefetch = 0 : i64, scratch_operands = 2 : i64, tpu.core_type = #tpu.core_type<tc>, window_params = [{transform_indices = @transform_0, window_bounds = array<i64: 8, 8, 8>}, {pipeline_mode = #tpu.pipeline_mode<synchronous>, transform_indices = @transform_1, window_bounds = array<i64: 8, 512>}, {pipeline_mode = #tpu.pipeline_mode<synchronous>, transform_indices = @transform_2, window_bounds = array<i64: 1, 512>}, {pipeline_mode = #tpu.pipeline_mode<synchronous>, transform_indices = @transform_3, window_bounds = array<i64: 128, 512>}, {pipeline_mode = #tpu.pipeline_mode<synchronous>, transform_indices = @transform_4, window_bounds = array<i64: 128, 128>}, {pipeline_mode = #tpu.pipeline_mode<synchronous>, transform_indices = @transform_5, window_bounds = array<i64: 1, 128>}, {transform_indices = @transform_6, window_bounds = array<i64: 8, 128>}]} {
    %c0_i32 = arith.constant 0 : i32
    %0 = arith.cmpi eq, %arg1, %c0_i32 : i32
    %1 = arith.extui %0 : i1 to i32
    %c0_i32_0 = arith.constant 0 : i32
    %2 = arith.cmpi ne, %1, %c0_i32_0 : i32
    scf.if %2 {
      %cst_148 = arith.constant 0.000000e+00 : f32
      %333 = vector.broadcast %cst_148 : f32 to vector<8x128xf32>
      %c0_149 = arith.constant 0 : index
      %c0_150 = arith.constant 0 : index
      %334 = vector.load %arg9[%c0_149, %c0_150] : memref<8x128xf32, #tpu.memory_space<vmem>>, vector<8x128xf32>
      tpu.vector_store %arg9[%c0_149, %c0_150], %333 {strides = array<i32>} : memref<8x128xf32, #tpu.memory_space<vmem>>, vector<8x128xf32>,
      %cst_151 = arith.constant 0.000000e+00 : f32
      %335 = vector.broadcast %cst_151 : f32 to vector<8x128xf32>
      %c0_152 = arith.constant 0 : index
      %c0_153 = arith.constant 0 : index
      %336 = vector.load %arg10[%c0_152, %c0_153] : memref<8x128xf32, #tpu.memory_space<vmem>>, vector<8x128xf32>
      tpu.vector_store %arg10[%c0_152, %c0_153], %335 {strides = array<i32>} : memref<8x128xf32, #tpu.memory_space<vmem>>, vector<8x128xf32>,
    } else {
    }
    %c0 = arith.constant 0 : index
    %c0_1 = arith.constant 0 : index
    %3 = vector.load %arg4[%c0, %c0_1] : memref<1x512xf32, #tpu.memory_space<vmem>>, vector<1x512xf32>
    %4 = vector.shape_cast %3 : vector<1x512xf32> to vector<1x512xf32>
    %5 = vector.broadcast %4 : vector<1x512xf32> to vector<8x512xf32>
    %c0_2 = arith.constant 0 : index
    %c0_3 = arith.constant 0 : index
    %6 = vector.load %arg9[%c0_2, %c0_3] : memref<8x128xf32, #tpu.memory_space<vmem>>, vector<8x128xf32>
    %c0_4 = arith.constant 0 : index
    %c0_5 = arith.constant 0 : index
    %7 = vector.load %arg10[%c0_4, %c0_5] : memref<8x128xf32, #tpu.memory_space<vmem>>, vector<8x128xf32>
    %c0_i32_6 = arith.constant 0 : i32
    %8 = arith.index_cast %c0_i32_6 : i32 to index
    %c0_7 = arith.constant 0 : index
    %c0_8 = arith.constant 0 : index
    %9 = vector.load %arg2[%8, %c0_7, %c0_8] : memref<8x8x8xf32, #tpu.memory_space<vmem>>, vector<1x8x8xf32>
    %10 = vector.shape_cast %9 : vector<1x8x8xf32> to vector<8x8xf32>
    %c0_9 = arith.constant 0 : index
    %c0_10 = arith.constant 0 : index
    %11 = vector.load %arg3[%c0_9, %c0_10] : memref<8x512xf32, #tpu.memory_space<vmem>>, vector<8x512xf32>
    %cst = arith.constant dense<0.000000e+00> : vector<8x512xf32>
    %12 = tpu.matmul %10, %11, %cst {dimension_numbers = #tpu.dot_dimension_numbers<[1], [0], [0], [1], [0, 0, 1, 1], [], []>} : vector<8x8xf32>, vector<8x512xf32>, vector<8x512xf32> -> vector<8x512xf32>
    %c0_11 = arith.constant 0 : index
    %c0_12 = arith.constant 0 : index
    %13 = vector.load %arg5[%c0_11, %c0_12] : memref<128x512xf32, #tpu.memory_space<vmem>>, vector<128x512xf32>
    %cst_13 = arith.constant dense<0.000000e+00> : vector<8x512xf32>
    %14 = tpu.matmul %6, %13, %cst_13 {dimension_numbers = #tpu.dot_dimension_numbers<[1], [0], [0], [1], [0, 0, 1, 1], [], []>} : vector<8x128xf32>, vector<128x512xf32>, vector<8x512xf32> -> vector<8x512xf32>
    %15 = arith.addf %12, %14 : vector<8x512xf32>
    %16 = arith.addf %15, %5 : vector<8x512xf32>
    %17 = vector.extract_strided_slice %16 {offsets = [0, 0], sizes = [8, 128], strides = [1, 1]} : vector<8x512xf32> to vector<8x128xf32>
    %cst_14 = arith.constant 5.000000e-01 : f32
    %18 = vector.broadcast %cst_14 : f32 to vector<8x128xf32>
    %19 = arith.mulf %18, %17 : vector<8x128xf32>
    %20 = math.tanh %19 : vector<8x128xf32>
    %cst_15 = arith.constant 5.000000e-01 : f32
    %21 = vector.broadcast %cst_15 : f32 to vector<8x128xf32>
    %22 = arith.mulf %21, %20 : vector<8x128xf32>
    %cst_16 = arith.constant 5.000000e-01 : f32
    %23 = vector.broadcast %cst_16 : f32 to vector<8x128xf32>
    %24 = arith.addf %22, %23 : vector<8x128xf32>
    %25 = vector.extract_strided_slice %16 {offsets = [0, 128], sizes = [8, 128], strides = [1, 1]} : vector<8x512xf32> to vector<8x128xf32>
    %cst_17 = arith.constant 5.000000e-01 : f32
    %26 = vector.broadcast %cst_17 : f32 to vector<8x128xf32>
    %27 = arith.mulf %26, %25 : vector<8x128xf32>
    %28 = math.tanh %27 : vector<8x128xf32>
    %cst_18 = arith.constant 5.000000e-01 : f32
    %29 = vector.broadcast %cst_18 : f32 to vector<8x128xf32>
    %30 = arith.mulf %29, %28 : vector<8x128xf32>
    %cst_19 = arith.constant 5.000000e-01 : f32
    %31 = vector.broadcast %cst_19 : f32 to vector<8x128xf32>
    %32 = arith.addf %30, %31 : vector<8x128xf32>
    %33 = vector.extract_strided_slice %16 {offsets = [0, 256], sizes = [8, 128], strides = [1, 1]} : vector<8x512xf32> to vector<8x128xf32>
    %34 = math.tanh %33 : vector<8x128xf32>
    %35 = vector.extract_strided_slice %16 {offsets = [0, 384], sizes = [8, 128], strides = [1, 1]} : vector<8x512xf32> to vector<8x128xf32>
    %cst_20 = arith.constant 5.000000e-01 : f32
    %36 = vector.broadcast %cst_20 : f32 to vector<8x128xf32>
    %37 = arith.mulf %36, %35 : vector<8x128xf32>
    %38 = math.tanh %37 : vector<8x128xf32>
    %cst_21 = arith.constant 5.000000e-01 : f32
    %39 = vector.broadcast %cst_21 : f32 to vector<8x128xf32>
    %40 = arith.mulf %39, %38 : vector<8x128xf32>
    %cst_22 = arith.constant 5.000000e-01 : f32
    %41 = vector.broadcast %cst_22 : f32 to vector<8x128xf32>
    %42 = arith.addf %40, %41 : vector<8x128xf32>
    %43 = arith.mulf %32, %7 : vector<8x128xf32>
    %44 = arith.mulf %24, %34 : vector<8x128xf32>
    %45 = arith.addf %43, %44 : vector<8x128xf32>
    %46 = math.tanh %45 : vector<8x128xf32>
    %47 = arith.mulf %42, %46 : vector<8x128xf32>
    %c1_i32 = arith.constant 1 : i32
    %48 = arith.index_cast %c1_i32 : i32 to index
    %c0_23 = arith.constant 0 : index
    %c0_24 = arith.constant 0 : index
    %49 = vector.load %arg2[%48, %c0_23, %c0_24] : memref<8x8x8xf32, #tpu.memory_space<vmem>>, vector<1x8x8xf32>
    %50 = vector.shape_cast %49 : vector<1x8x8xf32> to vector<8x8xf32>
    %c0_25 = arith.constant 0 : index
    %c0_26 = arith.constant 0 : index
    %51 = vector.load %arg3[%c0_25, %c0_26] : memref<8x512xf32, #tpu.memory_space<vmem>>, vector<8x512xf32>
    %cst_27 = arith.constant dense<0.000000e+00> : vector<8x512xf32>
    %52 = tpu.matmul %50, %51, %cst_27 {dimension_numbers = #tpu.dot_dimension_numbers<[1], [0], [0], [1], [0, 0, 1, 1], [], []>} : vector<8x8xf32>, vector<8x512xf32>, vector<8x512xf32> -> vector<8x512xf32>
    %c0_28 = arith.constant 0 : index
    %c0_29 = arith.constant 0 : index
    %53 = vector.load %arg5[%c0_28, %c0_29] : memref<128x512xf32, #tpu.memory_space<vmem>>, vector<128x512xf32>
    %cst_30 = arith.constant dense<0.000000e+00> : vector<8x512xf32>
    %54 = tpu.matmul %47, %53, %cst_30 {dimension_numbers = #tpu.dot_dimension_numbers<[1], [0], [0], [1], [0, 0, 1, 1], [], []>} : vector<8x128xf32>, vector<128x512xf32>, vector<8x512xf32> -> vector<8x512xf32>
    %55 = arith.addf %52, %54 : vector<8x512xf32>
    %56 = arith.addf %55, %5 : vector<8x512xf32>
    %57 = vector.extract_strided_slice %56 {offsets = [0, 0], sizes = [8, 128], strides = [1, 1]} : vector<8x512xf32> to vector<8x128xf32>
    %cst_31 = arith.constant 5.000000e-01 : f32
    %58 = vector.broadcast %cst_31 : f32 to vector<8x128xf32>
    %59 = arith.mulf %58, %57 : vector<8x128xf32>
    %60 = math.tanh %59 : vector<8x128xf32>
    %cst_32 = arith.constant 5.000000e-01 : f32
    %61 = vector.broadcast %cst_32 : f32 to vector<8x128xf32>
    %62 = arith.mulf %61, %60 : vector<8x128xf32>
    %cst_33 = arith.constant 5.000000e-01 : f32
    %63 = vector.broadcast %cst_33 : f32 to vector<8x128xf32>
    %64 = arith.addf %62, %63 : vector<8x128xf32>
    %65 = vector.extract_strided_slice %56 {offsets = [0, 128], sizes = [8, 128], strides = [1, 1]} : vector<8x512xf32> to vector<8x128xf32>
    %cst_34 = arith.constant 5.000000e-01 : f32
    %66 = vector.broadcast %cst_34 : f32 to vector<8x128xf32>
    %67 = arith.mulf %66, %65 : vector<8x128xf32>
    %68 = math.tanh %67 : vector<8x128xf32>
    %cst_35 = arith.constant 5.000000e-01 : f32
    %69 = vector.broadcast %cst_35 : f32 to vector<8x128xf32>
    %70 = arith.mulf %69, %68 : vector<8x128xf32>
    %cst_36 = arith.constant 5.000000e-01 : f32
    %71 = vector.broadcast %cst_36 : f32 to vector<8x128xf32>
    %72 = arith.addf %70, %71 : vector<8x128xf32>
    %73 = vector.extract_strided_slice %56 {offsets = [0, 256], sizes = [8, 128], strides = [1, 1]} : vector<8x512xf32> to vector<8x128xf32>
    %74 = math.tanh %73 : vector<8x128xf32>
    %75 = vector.extract_strided_slice %56 {offsets = [0, 384], sizes = [8, 128], strides = [1, 1]} : vector<8x512xf32> to vector<8x128xf32>
    %cst_37 = arith.constant 5.000000e-01 : f32
    %76 = vector.broadcast %cst_37 : f32 to vector<8x128xf32>
    %77 = arith.mulf %76, %75 : vector<8x128xf32>
    %78 = math.tanh %77 : vector<8x128xf32>
    %cst_38 = arith.constant 5.000000e-01 : f32
    %79 = vector.broadcast %cst_38 : f32 to vector<8x128xf32>
    %80 = arith.mulf %79, %78 : vector<8x128xf32>
    %cst_39 = arith.constant 5.000000e-01 : f32
    %81 = vector.broadcast %cst_39 : f32 to vector<8x128xf32>
    %82 = arith.addf %80, %81 : vector<8x128xf32>
    %83 = arith.mulf %72, %45 : vector<8x128xf32>
    %84 = arith.mulf %64, %74 : vector<8x128xf32>
    %85 = arith.addf %83, %84 : vector<8x128xf32>
    %86 = math.tanh %85 : vector<8x128xf32>
    %87 = arith.mulf %82, %86 : vector<8x128xf32>
    %c2_i32 = arith.constant 2 : i32
    %88 = arith.index_cast %c2_i32 : i32 to index
    %c0_40 = arith.constant 0 : index
    %c0_41 = arith.constant 0 : index
    %89 = vector.load %arg2[%88, %c0_40, %c0_41] : memref<8x8x8xf32, #tpu.memory_space<vmem>>, vector<1x8x8xf32>
    %90 = vector.shape_cast %89 : vector<1x8x8xf32> to vector<8x8xf32>
    %c0_42 = arith.constant 0 : index
    %c0_43 = arith.constant 0 : index
    %91 = vector.load %arg3[%c0_42, %c0_43] : memref<8x512xf32, #tpu.memory_space<vmem>>, vector<8x512xf32>
    %cst_44 = arith.constant dense<0.000000e+00> : vector<8x512xf32>
    %92 = tpu.matmul %90, %91, %cst_44 {dimension_numbers = #tpu.dot_dimension_numbers<[1], [0], [0], [1], [0, 0, 1, 1], [], []>} : vector<8x8xf32>, vector<8x512xf32>, vector<8x512xf32> -> vector<8x512xf32>
    %c0_45 = arith.constant 0 : index
    %c0_46 = arith.constant 0 : index
    %93 = vector.load %arg5[%c0_45, %c0_46] : memref<128x512xf32, #tpu.memory_space<vmem>>, vector<128x512xf32>
    %cst_47 = arith.constant dense<0.000000e+00> : vector<8x512xf32>
    %94 = tpu.matmul %87, %93, %cst_47 {dimension_numbers = #tpu.dot_dimension_numbers<[1], [0], [0], [1], [0, 0, 1, 1], [], []>} : vector<8x128xf32>, vector<128x512xf32>, vector<8x512xf32> -> vector<8x512xf32>
    %95 = arith.addf %92, %94 : vector<8x512xf32>
    %96 = arith.addf %95, %5 : vector<8x512xf32>
    %97 = vector.extract_strided_slice %96 {offsets = [0, 0], sizes = [8, 128], strides = [1, 1]} : vector<8x512xf32> to vector<8x128xf32>
    %cst_48 = arith.constant 5.000000e-01 : f32
    %98 = vector.broadcast %cst_48 : f32 to vector<8x128xf32>
    %99 = arith.mulf %98, %97 : vector<8x128xf32>
    %100 = math.tanh %99 : vector<8x128xf32>
    %cst_49 = arith.constant 5.000000e-01 : f32
    %101 = vector.broadcast %cst_49 : f32 to vector<8x128xf32>
    %102 = arith.mulf %101, %100 : vector<8x128xf32>
    %cst_50 = arith.constant 5.000000e-01 : f32
    %103 = vector.broadcast %cst_50 : f32 to vector<8x128xf32>
    %104 = arith.addf %102, %103 : vector<8x128xf32>
    %105 = vector.extract_strided_slice %96 {offsets = [0, 128], sizes = [8, 128], strides = [1, 1]} : vector<8x512xf32> to vector<8x128xf32>
    %cst_51 = arith.constant 5.000000e-01 : f32
    %106 = vector.broadcast %cst_51 : f32 to vector<8x128xf32>
    %107 = arith.mulf %106, %105 : vector<8x128xf32>
    %108 = math.tanh %107 : vector<8x128xf32>
    %cst_52 = arith.constant 5.000000e-01 : f32
    %109 = vector.broadcast %cst_52 : f32 to vector<8x128xf32>
    %110 = arith.mulf %109, %108 : vector<8x128xf32>
    %cst_53 = arith.constant 5.000000e-01 : f32
    %111 = vector.broadcast %cst_53 : f32 to vector<8x128xf32>
    %112 = arith.addf %110, %111 : vector<8x128xf32>
    %113 = vector.extract_strided_slice %96 {offsets = [0, 256], sizes = [8, 128], strides = [1, 1]} : vector<8x512xf32> to vector<8x128xf32>
    %114 = math.tanh %113 : vector<8x128xf32>
    %115 = vector.extract_strided_slice %96 {offsets = [0, 384], sizes = [8, 128], strides = [1, 1]} : vector<8x512xf32> to vector<8x128xf32>
    %cst_54 = arith.constant 5.000000e-01 : f32
    %116 = vector.broadcast %cst_54 : f32 to vector<8x128xf32>
    %117 = arith.mulf %116, %115 : vector<8x128xf32>
    %118 = math.tanh %117 : vector<8x128xf32>
    %cst_55 = arith.constant 5.000000e-01 : f32
    %119 = vector.broadcast %cst_55 : f32 to vector<8x128xf32>
    %120 = arith.mulf %119, %118 : vector<8x128xf32>
    %cst_56 = arith.constant 5.000000e-01 : f32
    %121 = vector.broadcast %cst_56 : f32 to vector<8x128xf32>
    %122 = arith.addf %120, %121 : vector<8x128xf32>
    %123 = arith.mulf %112, %85 : vector<8x128xf32>
    %124 = arith.mulf %104, %114 : vector<8x128xf32>
    %125 = arith.addf %123, %124 : vector<8x128xf32>
    %126 = math.tanh %125 : vector<8x128xf32>
    %127 = arith.mulf %122, %126 : vector<8x128xf32>
    %c3_i32 = arith.constant 3 : i32
    %128 = arith.index_cast %c3_i32 : i32 to index
    %c0_57 = arith.constant 0 : index
    %c0_58 = arith.constant 0 : index
    %129 = vector.load %arg2[%128, %c0_57, %c0_58] : memref<8x8x8xf32, #tpu.memory_space<vmem>>, vector<1x8x8xf32>
    %130 = vector.shape_cast %129 : vector<1x8x8xf32> to vector<8x8xf32>
    %c0_59 = arith.constant 0 : index
    %c0_60 = arith.constant 0 : index
    %131 = vector.load %arg3[%c0_59, %c0_60] : memref<8x512xf32, #tpu.memory_space<vmem>>, vector<8x512xf32>
    %cst_61 = arith.constant dense<0.000000e+00> : vector<8x512xf32>
    %132 = tpu.matmul %130, %131, %cst_61 {dimension_numbers = #tpu.dot_dimension_numbers<[1], [0], [0], [1], [0, 0, 1, 1], [], []>} : vector<8x8xf32>, vector<8x512xf32>, vector<8x512xf32> -> vector<8x512xf32>
    %c0_62 = arith.constant 0 : index
    %c0_63 = arith.constant 0 : index
    %133 = vector.load %arg5[%c0_62, %c0_63] : memref<128x512xf32, #tpu.memory_space<vmem>>, vector<128x512xf32>
    %cst_64 = arith.constant dense<0.000000e+00> : vector<8x512xf32>
    %134 = tpu.matmul %127, %133, %cst_64 {dimension_numbers = #tpu.dot_dimension_numbers<[1], [0], [0], [1], [0, 0, 1, 1], [], []>} : vector<8x128xf32>, vector<128x512xf32>, vector<8x512xf32> -> vector<8x512xf32>
    %135 = arith.addf %132, %134 : vector<8x512xf32>
    %136 = arith.addf %135, %5 : vector<8x512xf32>
    %137 = vector.extract_strided_slice %136 {offsets = [0, 0], sizes = [8, 128], strides = [1, 1]} : vector<8x512xf32> to vector<8x128xf32>
    %cst_65 = arith.constant 5.000000e-01 : f32
    %138 = vector.broadcast %cst_65 : f32 to vector<8x128xf32>
    %139 = arith.mulf %138, %137 : vector<8x128xf32>
    %140 = math.tanh %139 : vector<8x128xf32>
    %cst_66 = arith.constant 5.000000e-01 : f32
    %141 = vector.broadcast %cst_66 : f32 to vector<8x128xf32>
    %142 = arith.mulf %141, %140 : vector<8x128xf32>
    %cst_67 = arith.constant 5.000000e-01 : f32
    %143 = vector.broadcast %cst_67 : f32 to vector<8x128xf32>
    %144 = arith.addf %142, %143 : vector<8x128xf32>
    %145 = vector.extract_strided_slice %136 {offsets = [0, 128], sizes = [8, 128], strides = [1, 1]} : vector<8x512xf32> to vector<8x128xf32>
    %cst_68 = arith.constant 5.000000e-01 : f32
    %146 = vector.broadcast %cst_68 : f32 to vector<8x128xf32>
    %147 = arith.mulf %146, %145 : vector<8x128xf32>
    %148 = math.tanh %147 : vector<8x128xf32>
    %cst_69 = arith.constant 5.000000e-01 : f32
    %149 = vector.broadcast %cst_69 : f32 to vector<8x128xf32>
    %150 = arith.mulf %149, %148 : vector<8x128xf32>
    %cst_70 = arith.constant 5.000000e-01 : f32
    %151 = vector.broadcast %cst_70 : f32 to vector<8x128xf32>
    %152 = arith.addf %150, %151 : vector<8x128xf32>
    %153 = vector.extract_strided_slice %136 {offsets = [0, 256], sizes = [8, 128], strides = [1, 1]} : vector<8x512xf32> to vector<8x128xf32>
    %154 = math.tanh %153 : vector<8x128xf32>
    %155 = vector.extract_strided_slice %136 {offsets = [0, 384], sizes = [8, 128], strides = [1, 1]} : vector<8x512xf32> to vector<8x128xf32>
    %cst_71 = arith.constant 5.000000e-01 : f32
    %156 = vector.broadcast %cst_71 : f32 to vector<8x128xf32>
    %157 = arith.mulf %156, %155 : vector<8x128xf32>
    %158 = math.tanh %157 : vector<8x128xf32>
    %cst_72 = arith.constant 5.000000e-01 : f32
    %159 = vector.broadcast %cst_72 : f32 to vector<8x128xf32>
    %160 = arith.mulf %159, %158 : vector<8x128xf32>
    %cst_73 = arith.constant 5.000000e-01 : f32
    %161 = vector.broadcast %cst_73 : f32 to vector<8x128xf32>
    %162 = arith.addf %160, %161 : vector<8x128xf32>
    %163 = arith.mulf %152, %125 : vector<8x128xf32>
    %164 = arith.mulf %144, %154 : vector<8x128xf32>
    %165 = arith.addf %163, %164 : vector<8x128xf32>
    %166 = math.tanh %165 : vector<8x128xf32>
    %167 = arith.mulf %162, %166 : vector<8x128xf32>
    %c4_i32 = arith.constant 4 : i32
    %168 = arith.index_cast %c4_i32 : i32 to index
    %c0_74 = arith.constant 0 : index
    %c0_75 = arith.constant 0 : index
    %169 = vector.load %arg2[%168, %c0_74, %c0_75] : memref<8x8x8xf32, #tpu.memory_space<vmem>>, vector<1x8x8xf32>
    %170 = vector.shape_cast %169 : vector<1x8x8xf32> to vector<8x8xf32>
    %c0_76 = arith.constant 0 : index
    %c0_77 = arith.constant 0 : index
    %171 = vector.load %arg3[%c0_76, %c0_77] : memref<8x512xf32, #tpu.memory_space<vmem>>, vector<8x512xf32>
    %cst_78 = arith.constant dense<0.000000e+00> : vector<8x512xf32>
    %172 = tpu.matmul %170, %171, %cst_78 {dimension_numbers = #tpu.dot_dimension_numbers<[1], [0], [0], [1], [0, 0, 1, 1], [], []>} : vector<8x8xf32>, vector<8x512xf32>, vector<8x512xf32> -> vector<8x512xf32>
    %c0_79 = arith.constant 0 : index
    %c0_80 = arith.constant 0 : index
    %173 = vector.load %arg5[%c0_79, %c0_80] : memref<128x512xf32, #tpu.memory_space<vmem>>, vector<128x512xf32>
    %cst_81 = arith.constant dense<0.000000e+00> : vector<8x512xf32>
    %174 = tpu.matmul %167, %173, %cst_81 {dimension_numbers = #tpu.dot_dimension_numbers<[1], [0], [0], [1], [0, 0, 1, 1], [], []>} : vector<8x128xf32>, vector<128x512xf32>, vector<8x512xf32> -> vector<8x512xf32>
    %175 = arith.addf %172, %174 : vector<8x512xf32>
    %176 = arith.addf %175, %5 : vector<8x512xf32>
    %177 = vector.extract_strided_slice %176 {offsets = [0, 0], sizes = [8, 128], strides = [1, 1]} : vector<8x512xf32> to vector<8x128xf32>
    %cst_82 = arith.constant 5.000000e-01 : f32
    %178 = vector.broadcast %cst_82 : f32 to vector<8x128xf32>
    %179 = arith.mulf %178, %177 : vector<8x128xf32>
    %180 = math.tanh %179 : vector<8x128xf32>
    %cst_83 = arith.constant 5.000000e-01 : f32
    %181 = vector.broadcast %cst_83 : f32 to vector<8x128xf32>
    %182 = arith.mulf %181, %180 : vector<8x128xf32>
    %cst_84 = arith.constant 5.000000e-01 : f32
    %183 = vector.broadcast %cst_84 : f32 to vector<8x128xf32>
    %184 = arith.addf %182, %183 : vector<8x128xf32>
    %185 = vector.extract_strided_slice %176 {offsets = [0, 128], sizes = [8, 128], strides = [1, 1]} : vector<8x512xf32> to vector<8x128xf32>
    %cst_85 = arith.constant 5.000000e-01 : f32
    %186 = vector.broadcast %cst_85 : f32 to vector<8x128xf32>
    %187 = arith.mulf %186, %185 : vector<8x128xf32>
    %188 = math.tanh %187 : vector<8x128xf32>
    %cst_86 = arith.constant 5.000000e-01 : f32
    %189 = vector.broadcast %cst_86 : f32 to vector<8x128xf32>
    %190 = arith.mulf %189, %188 : vector<8x128xf32>
    %cst_87 = arith.constant 5.000000e-01 : f32
    %191 = vector.broadcast %cst_87 : f32 to vector<8x128xf32>
    %192 = arith.addf %190, %191 : vector<8x128xf32>
    %193 = vector.extract_strided_slice %176 {offsets = [0, 256], sizes = [8, 128], strides = [1, 1]} : vector<8x512xf32> to vector<8x128xf32>
    %194 = math.tanh %193 : vector<8x128xf32>
    %195 = vector.extract_strided_slice %176 {offsets = [0, 384], sizes = [8, 128], strides = [1, 1]} : vector<8x512xf32> to vector<8x128xf32>
    %cst_88 = arith.constant 5.000000e-01 : f32
    %196 = vector.broadcast %cst_88 : f32 to vector<8x128xf32>
    %197 = arith.mulf %196, %195 : vector<8x128xf32>
    %198 = math.tanh %197 : vector<8x128xf32>
    %cst_89 = arith.constant 5.000000e-01 : f32
    %199 = vector.broadcast %cst_89 : f32 to vector<8x128xf32>
    %200 = arith.mulf %199, %198 : vector<8x128xf32>
    %cst_90 = arith.constant 5.000000e-01 : f32
    %201 = vector.broadcast %cst_90 : f32 to vector<8x128xf32>
    %202 = arith.addf %200, %201 : vector<8x128xf32>
    %203 = arith.mulf %192, %165 : vector<8x128xf32>
    %204 = arith.mulf %184, %194 : vector<8x128xf32>
    %205 = arith.addf %203, %204 : vector<8x128xf32>
    %206 = math.tanh %205 : vector<8x128xf32>
    %207 = arith.mulf %202, %206 : vector<8x128xf32>
    %c5_i32 = arith.constant 5 : i32
    %208 = arith.index_cast %c5_i32 : i32 to index
    %c0_91 = arith.constant 0 : index
    %c0_92 = arith.constant 0 : index
    %209 = vector.load %arg2[%208, %c0_91, %c0_92] : memref<8x8x8xf32, #tpu.memory_space<vmem>>, vector<1x8x8xf32>
    %210 = vector.shape_cast %209 : vector<1x8x8xf32> to vector<8x8xf32>
    %c0_93 = arith.constant 0 : index
    %c0_94 = arith.constant 0 : index
    %211 = vector.load %arg3[%c0_93, %c0_94] : memref<8x512xf32, #tpu.memory_space<vmem>>, vector<8x512xf32>
    %cst_95 = arith.constant dense<0.000000e+00> : vector<8x512xf32>
    %212 = tpu.matmul %210, %211, %cst_95 {dimension_numbers = #tpu.dot_dimension_numbers<[1], [0], [0], [1], [0, 0, 1, 1], [], []>} : vector<8x8xf32>, vector<8x512xf32>, vector<8x512xf32> -> vector<8x512xf32>
    %c0_96 = arith.constant 0 : index
    %c0_97 = arith.constant 0 : index
    %213 = vector.load %arg5[%c0_96, %c0_97] : memref<128x512xf32, #tpu.memory_space<vmem>>, vector<128x512xf32>
    %cst_98 = arith.constant dense<0.000000e+00> : vector<8x512xf32>
    %214 = tpu.matmul %207, %213, %cst_98 {dimension_numbers = #tpu.dot_dimension_numbers<[1], [0], [0], [1], [0, 0, 1, 1], [], []>} : vector<8x128xf32>, vector<128x512xf32>, vector<8x512xf32> -> vector<8x512xf32>
    %215 = arith.addf %212, %214 : vector<8x512xf32>
    %216 = arith.addf %215, %5 : vector<8x512xf32>
    %217 = vector.extract_strided_slice %216 {offsets = [0, 0], sizes = [8, 128], strides = [1, 1]} : vector<8x512xf32> to vector<8x128xf32>
    %cst_99 = arith.constant 5.000000e-01 : f32
    %218 = vector.broadcast %cst_99 : f32 to vector<8x128xf32>
    %219 = arith.mulf %218, %217 : vector<8x128xf32>
    %220 = math.tanh %219 : vector<8x128xf32>
    %cst_100 = arith.constant 5.000000e-01 : f32
    %221 = vector.broadcast %cst_100 : f32 to vector<8x128xf32>
    %222 = arith.mulf %221, %220 : vector<8x128xf32>
    %cst_101 = arith.constant 5.000000e-01 : f32
    %223 = vector.broadcast %cst_101 : f32 to vector<8x128xf32>
    %224 = arith.addf %222, %223 : vector<8x128xf32>
    %225 = vector.extract_strided_slice %216 {offsets = [0, 128], sizes = [8, 128], strides = [1, 1]} : vector<8x512xf32> to vector<8x128xf32>
    %cst_102 = arith.constant 5.000000e-01 : f32
    %226 = vector.broadcast %cst_102 : f32 to vector<8x128xf32>
    %227 = arith.mulf %226, %225 : vector<8x128xf32>
    %228 = math.tanh %227 : vector<8x128xf32>
    %cst_103 = arith.constant 5.000000e-01 : f32
    %229 = vector.broadcast %cst_103 : f32 to vector<8x128xf32>
    %230 = arith.mulf %229, %228 : vector<8x128xf32>
    %cst_104 = arith.constant 5.000000e-01 : f32
    %231 = vector.broadcast %cst_104 : f32 to vector<8x128xf32>
    %232 = arith.addf %230, %231 : vector<8x128xf32>
    %233 = vector.extract_strided_slice %216 {offsets = [0, 256], sizes = [8, 128], strides = [1, 1]} : vector<8x512xf32> to vector<8x128xf32>
    %234 = math.tanh %233 : vector<8x128xf32>
    %235 = vector.extract_strided_slice %216 {offsets = [0, 384], sizes = [8, 128], strides = [1, 1]} : vector<8x512xf32> to vector<8x128xf32>
    %cst_105 = arith.constant 5.000000e-01 : f32
    %236 = vector.broadcast %cst_105 : f32 to vector<8x128xf32>
    %237 = arith.mulf %236, %235 : vector<8x128xf32>
    %238 = math.tanh %237 : vector<8x128xf32>
    %cst_106 = arith.constant 5.000000e-01 : f32
    %239 = vector.broadcast %cst_106 : f32 to vector<8x128xf32>
    %240 = arith.mulf %239, %238 : vector<8x128xf32>
    %cst_107 = arith.constant 5.000000e-01 : f32
    %241 = vector.broadcast %cst_107 : f32 to vector<8x128xf32>
    %242 = arith.addf %240, %241 : vector<8x128xf32>
    %243 = arith.mulf %232, %205 : vector<8x128xf32>
    %244 = arith.mulf %224, %234 : vector<8x128xf32>
    %245 = arith.addf %243, %244 : vector<8x128xf32>
    %246 = math.tanh %245 : vector<8x128xf32>
    %247 = arith.mulf %242, %246 : vector<8x128xf32>
    %c6_i32 = arith.constant 6 : i32
    %248 = arith.index_cast %c6_i32 : i32 to index
    %c0_108 = arith.constant 0 : index
    %c0_109 = arith.constant 0 : index
    %249 = vector.load %arg2[%248, %c0_108, %c0_109] : memref<8x8x8xf32, #tpu.memory_space<vmem>>, vector<1x8x8xf32>
    %250 = vector.shape_cast %249 : vector<1x8x8xf32> to vector<8x8xf32>
    %c0_110 = arith.constant 0 : index
    %c0_111 = arith.constant 0 : index
    %251 = vector.load %arg3[%c0_110, %c0_111] : memref<8x512xf32, #tpu.memory_space<vmem>>, vector<8x512xf32>
    %cst_112 = arith.constant dense<0.000000e+00> : vector<8x512xf32>
    %252 = tpu.matmul %250, %251, %cst_112 {dimension_numbers = #tpu.dot_dimension_numbers<[1], [0], [0], [1], [0, 0, 1, 1], [], []>} : vector<8x8xf32>, vector<8x512xf32>, vector<8x512xf32> -> vector<8x512xf32>
    %c0_113 = arith.constant 0 : index
    %c0_114 = arith.constant 0 : index
    %253 = vector.load %arg5[%c0_113, %c0_114] : memref<128x512xf32, #tpu.memory_space<vmem>>, vector<128x512xf32>
    %cst_115 = arith.constant dense<0.000000e+00> : vector<8x512xf32>
    %254 = tpu.matmul %247, %253, %cst_115 {dimension_numbers = #tpu.dot_dimension_numbers<[1], [0], [0], [1], [0, 0, 1, 1], [], []>} : vector<8x128xf32>, vector<128x512xf32>, vector<8x512xf32> -> vector<8x512xf32>
    %255 = arith.addf %252, %254 : vector<8x512xf32>
    %256 = arith.addf %255, %5 : vector<8x512xf32>
    %257 = vector.extract_strided_slice %256 {offsets = [0, 0], sizes = [8, 128], strides = [1, 1]} : vector<8x512xf32> to vector<8x128xf32>
    %cst_116 = arith.constant 5.000000e-01 : f32
    %258 = vector.broadcast %cst_116 : f32 to vector<8x128xf32>
    %259 = arith.mulf %258, %257 : vector<8x128xf32>
    %260 = math.tanh %259 : vector<8x128xf32>
    %cst_117 = arith.constant 5.000000e-01 : f32
    %261 = vector.broadcast %cst_117 : f32 to vector<8x128xf32>
    %262 = arith.mulf %261, %260 : vector<8x128xf32>
    %cst_118 = arith.constant 5.000000e-01 : f32
    %263 = vector.broadcast %cst_118 : f32 to vector<8x128xf32>
    %264 = arith.addf %262, %263 : vector<8x128xf32>
    %265 = vector.extract_strided_slice %256 {offsets = [0, 128], sizes = [8, 128], strides = [1, 1]} : vector<8x512xf32> to vector<8x128xf32>
    %cst_119 = arith.constant 5.000000e-01 : f32
    %266 = vector.broadcast %cst_119 : f32 to vector<8x128xf32>
    %267 = arith.mulf %266, %265 : vector<8x128xf32>
    %268 = math.tanh %267 : vector<8x128xf32>
    %cst_120 = arith.constant 5.000000e-01 : f32
    %269 = vector.broadcast %cst_120 : f32 to vector<8x128xf32>
    %270 = arith.mulf %269, %268 : vector<8x128xf32>
    %cst_121 = arith.constant 5.000000e-01 : f32
    %271 = vector.broadcast %cst_121 : f32 to vector<8x128xf32>
    %272 = arith.addf %270, %271 : vector<8x128xf32>
    %273 = vector.extract_strided_slice %256 {offsets = [0, 256], sizes = [8, 128], strides = [1, 1]} : vector<8x512xf32> to vector<8x128xf32>
    %274 = math.tanh %273 : vector<8x128xf32>
    %275 = vector.extract_strided_slice %256 {offsets = [0, 384], sizes = [8, 128], strides = [1, 1]} : vector<8x512xf32> to vector<8x128xf32>
    %cst_122 = arith.constant 5.000000e-01 : f32
    %276 = vector.broadcast %cst_122 : f32 to vector<8x128xf32>
    %277 = arith.mulf %276, %275 : vector<8x128xf32>
    %278 = math.tanh %277 : vector<8x128xf32>
    %cst_123 = arith.constant 5.000000e-01 : f32
    %279 = vector.broadcast %cst_123 : f32 to vector<8x128xf32>
    %280 = arith.mulf %279, %278 : vector<8x128xf32>
    %cst_124 = arith.constant 5.000000e-01 : f32
    %281 = vector.broadcast %cst_124 : f32 to vector<8x128xf32>
    %282 = arith.addf %280, %281 : vector<8x128xf32>
    %283 = arith.mulf %272, %245 : vector<8x128xf32>
    %284 = arith.mulf %264, %274 : vector<8x128xf32>
    %285 = arith.addf %283, %284 : vector<8x128xf32>
    %286 = math.tanh %285 : vector<8x128xf32>
    %287 = arith.mulf %282, %286 : vector<8x128xf32>
    %c7_i32 = arith.constant 7 : i32
    %288 = arith.index_cast %c7_i32 : i32 to index
    %c0_125 = arith.constant 0 : index
    %c0_126 = arith.constant 0 : index
    %289 = vector.load %arg2[%288, %c0_125, %c0_126] : memref<8x8x8xf32, #tpu.memory_space<vmem>>, vector<1x8x8xf32>
    %290 = vector.shape_cast %289 : vector<1x8x8xf32> to vector<8x8xf32>
    %c0_127 = arith.constant 0 : index
    %c0_128 = arith.constant 0 : index
    %291 = vector.load %arg3[%c0_127, %c0_128] : memref<8x512xf32, #tpu.memory_space<vmem>>, vector<8x512xf32>
    %cst_129 = arith.constant dense<0.000000e+00> : vector<8x512xf32>
    %292 = tpu.matmul %290, %291, %cst_129 {dimension_numbers = #tpu.dot_dimension_numbers<[1], [0], [0], [1], [0, 0, 1, 1], [], []>} : vector<8x8xf32>, vector<8x512xf32>, vector<8x512xf32> -> vector<8x512xf32>
    %c0_130 = arith.constant 0 : index
    %c0_131 = arith.constant 0 : index
    %293 = vector.load %arg5[%c0_130, %c0_131] : memref<128x512xf32, #tpu.memory_space<vmem>>, vector<128x512xf32>
    %cst_132 = arith.constant dense<0.000000e+00> : vector<8x512xf32>
    %294 = tpu.matmul %287, %293, %cst_132 {dimension_numbers = #tpu.dot_dimension_numbers<[1], [0], [0], [1], [0, 0, 1, 1], [], []>} : vector<8x128xf32>, vector<128x512xf32>, vector<8x512xf32> -> vector<8x512xf32>
    %295 = arith.addf %292, %294 : vector<8x512xf32>
    %296 = arith.addf %295, %5 : vector<8x512xf32>
    %297 = vector.extract_strided_slice %296 {offsets = [0, 0], sizes = [8, 128], strides = [1, 1]} : vector<8x512xf32> to vector<8x128xf32>
    %cst_133 = arith.constant 5.000000e-01 : f32
    %298 = vector.broadcast %cst_133 : f32 to vector<8x128xf32>
    %299 = arith.mulf %298, %297 : vector<8x128xf32>
    %300 = math.tanh %299 : vector<8x128xf32>
    %cst_134 = arith.constant 5.000000e-01 : f32
    %301 = vector.broadcast %cst_134 : f32 to vector<8x128xf32>
    %302 = arith.mulf %301, %300 : vector<8x128xf32>
    %cst_135 = arith.constant 5.000000e-01 : f32
    %303 = vector.broadcast %cst_135 : f32 to vector<8x128xf32>
    %304 = arith.addf %302, %303 : vector<8x128xf32>
    %305 = vector.extract_strided_slice %296 {offsets = [0, 128], sizes = [8, 128], strides = [1, 1]} : vector<8x512xf32> to vector<8x128xf32>
    %cst_136 = arith.constant 5.000000e-01 : f32
    %306 = vector.broadcast %cst_136 : f32 to vector<8x128xf32>
    %307 = arith.mulf %306, %305 : vector<8x128xf32>
    %308 = math.tanh %307 : vector<8x128xf32>
    %cst_137 = arith.constant 5.000000e-01 : f32
    %309 = vector.broadcast %cst_137 : f32 to vector<8x128xf32>
    %310 = arith.mulf %309, %308 : vector<8x128xf32>
    %cst_138 = arith.constant 5.000000e-01 : f32
    %311 = vector.broadcast %cst_138 : f32 to vector<8x128xf32>
    %312 = arith.addf %310, %311 : vector<8x128xf32>
    %313 = vector.extract_strided_slice %296 {offsets = [0, 256], sizes = [8, 128], strides = [1, 1]} : vector<8x512xf32> to vector<8x128xf32>
    %314 = math.tanh %313 : vector<8x128xf32>
    %315 = vector.extract_strided_slice %296 {offsets = [0, 384], sizes = [8, 128], strides = [1, 1]} : vector<8x512xf32> to vector<8x128xf32>
    %cst_139 = arith.constant 5.000000e-01 : f32
    %316 = vector.broadcast %cst_139 : f32 to vector<8x128xf32>
    %317 = arith.mulf %316, %315 : vector<8x128xf32>
    %318 = math.tanh %317 : vector<8x128xf32>
    %cst_140 = arith.constant 5.000000e-01 : f32
    %319 = vector.broadcast %cst_140 : f32 to vector<8x128xf32>
    %320 = arith.mulf %319, %318 : vector<8x128xf32>
    %cst_141 = arith.constant 5.000000e-01 : f32
    %321 = vector.broadcast %cst_141 : f32 to vector<8x128xf32>
    %322 = arith.addf %320, %321 : vector<8x128xf32>
    %323 = arith.mulf %312, %285 : vector<8x128xf32>
    %324 = arith.mulf %304, %314 : vector<8x128xf32>
    %325 = arith.addf %323, %324 : vector<8x128xf32>
    %326 = math.tanh %325 : vector<8x128xf32>
    %327 = arith.mulf %322, %326 : vector<8x128xf32>
    %c8_i32 = arith.constant 8 : i32
    %c0_142 = arith.constant 0 : index
    %c0_143 = arith.constant 0 : index
    %328 = vector.load %arg9[%c0_142, %c0_143] : memref<8x128xf32, #tpu.memory_space<vmem>>, vector<8x128xf32>
    tpu.vector_store %arg9[%c0_142, %c0_143], %327 {strides = array<i32>} : memref<8x128xf32, #tpu.memory_space<vmem>>, vector<8x128xf32>,
    %c0_144 = arith.constant 0 : index
    %c0_145 = arith.constant 0 : index
    %329 = vector.load %arg10[%c0_144, %c0_145] : memref<8x128xf32, #tpu.memory_space<vmem>>, vector<8x128xf32>
    tpu.vector_store %arg10[%c0_144, %c0_145], %325 {strides = array<i32>} : memref<8x128xf32, #tpu.memory_space<vmem>>, vector<8x128xf32>,
    %c0_i32_146 = arith.constant 0 : i32
    %330 = arith.cmpi eq, %arg1, %c0_i32_146 : i32
    %331 = arith.extui %330 : i1 to i32
    %c0_i32_147 = arith.constant 0 : i32
    %332 = arith.cmpi ne, %331, %c0_i32_147 : i32
    scf.if %332 {
      %c0_148 = arith.constant 0 : index
      %c0_149 = arith.constant 0 : index
      %333 = vector.load %arg6[%c0_148, %c0_149] : memref<128x128xf32, #tpu.memory_space<vmem>>, vector<128x128xf32>
      %cst_150 = arith.constant dense<0.000000e+00> : vector<8x128xf32>
      %334 = tpu.matmul %327, %333, %cst_150 {dimension_numbers = #tpu.dot_dimension_numbers<[1], [0], [0], [1], [0, 0, 1, 1], [], []>} : vector<8x128xf32>, vector<128x128xf32>, vector<8x128xf32> -> vector<8x128xf32>
      %c0_151 = arith.constant 0 : index
      %c0_152 = arith.constant 0 : index
      %335 = vector.load %arg7[%c0_151, %c0_152] : memref<1x128xf32, #tpu.memory_space<vmem>>, vector<1x128xf32>
      %336 = vector.broadcast %335 : vector<1x128xf32> to vector<8x128xf32>
      %337 = arith.addf %334, %336 : vector<8x128xf32>
      %c0_153 = arith.constant 0 : index
      %c0_154 = arith.constant 0 : index
      %338 = vector.load %arg8[%c0_153, %c0_154] : memref<8x128xf32, #tpu.memory_space<vmem>>, vector<8x128xf32>
      tpu.vector_store %arg8[%c0_153, %c0_154], %337 {strides = array<i32>} : memref<8x128xf32, #tpu.memory_space<vmem>>, vector<8x128xf32>,
    } else {
    }
    return
  }
  func.func @transform_0(%arg0: i32, %arg1: i32) -> (i32, i32, i32) {
    %c0_i32 = arith.constant 0 : i32
    %c0_i32_0 = arith.constant 0 : i32
    return %arg1, %arg0, %c0_i32 : i32, i32, i32
  }
  func.func @transform_1(%arg0: i32, %arg1: i32) -> (i32, i32) {
    %c0_i32 = arith.constant 0 : i32
    %c0_i32_0 = arith.constant 0 : i32
    %c0_i32_1 = arith.constant 0 : i32
    return %c0_i32, %c0_i32_0 : i32, i32
  }
  func.func @transform_2(%arg0: i32, %arg1: i32) -> (i32, i32) {
    %c0_i32 = arith.constant 0 : i32
    %c0_i32_0 = arith.constant 0 : i32
    %c0_i32_1 = arith.constant 0 : i32
    return %c0_i32, %c0_i32_0 : i32, i32
  }
  func.func @transform_3(%arg0: i32, %arg1: i32) -> (i32, i32) {
    %c0_i32 = arith.constant 0 : i32
    %c0_i32_0 = arith.constant 0 : i32
    %c0_i32_1 = arith.constant 0 : i32
    return %c0_i32, %c0_i32_0 : i32, i32
  }
  func.func @transform_4(%arg0: i32, %arg1: i32) -> (i32, i32) {
    %c0_i32 = arith.constant 0 : i32
    %c0_i32_0 = arith.constant 0 : i32
    %c0_i32_1 = arith.constant 0 : i32
    return %c0_i32, %c0_i32_0 : i32, i32
  }
  func.func @transform_5(%arg0: i32, %arg1: i32) -> (i32, i32) {
    %c0_i32 = arith.constant 0 : i32
    %c0_i32_0 = arith.constant 0 : i32
    %c0_i32_1 = arith.constant 0 : i32
    return %c0_i32, %c0_i32_0 : i32, i32
  }
  func.func @transform_6(%arg0: i32, %arg1: i32) -> (i32, i32) {
    %c0_i32 = arith.constant 0 : i32
    %c0_i32_0 = arith.constant 0 : i32
    return %arg0, %c0_i32 : i32, i32
  }
}

</mosaic_0001>

<bundles_post_ra>
// kernel: lstm_model_forward.1
= control target key start
LH: loop header
LB: loop body
LE: loop exit
PB: predicated region body
PF: predicated region fallthrough
CT: control target
= control target key end

     0   :  { %v3443_v3 = vmov 0.0   ;;  %vm264_vm0 = vcmask 64512   ;;  %vm3445_vm1 = vmmov 0   ;;  %s4253_s3 = inlined_call_operand.vmem [shape: f32[128,512], index: 3, kind: input, shape index: {}]   ;;  %s4254_s1 = inlined_call_operand.vmem [shape: f32[8,512], index: 1, kind: input, shape index: {}]   ;;  %s4255_s0 = inlined_call_operand.vmem [shape: f32[8,8,8], index: 0, kind: input, shape index: {}]   ;;  %s4256_s2 = inlined_call_operand.vmem [shape: f32[1,512], index: 2, kind: input, shape index: {}]   ;;  %s4257_s4 = inlined_call_operand.vmem [shape: f32[128,128], index: 4, kind: input, shape index: {}]   ;;  %s4258_s5 = inlined_call_operand.vmem [shape: f32[1,128], index: 5, kind: input, shape index: {}]   ;;  %s4259_s6 = inlined_call_operand.vmem [shape: f32[8,128], index: 6, kind: output, shape index: {}]  }
   0x1   :  { %v61_v0 = vld [vmem:[%s4253_s3 + $0x18] sm:$0xff]  ;;  %v60_v2 = vld [vmem:[%s4253_s3 + $0x10] sm:$0xff]  ;;  %257 = vmatprep.mubr.f32.mxu1 %v3443_v3  ;;  %186 = vmatprep.mubr.f32.mxu0 %v3443_v3  ;;  %v59_v6 = vld [vmem:[%s4253_s3 + $0x8] sm:$0xff] }
   0x2   :  { %v65_v1 = vld [vmem:[%s4253_s3 + $0x38] sm:$0xff]  ;;  %v64_v5 = vld [vmem:[%s4253_s3 + $0x30] sm:$0xff]  ;;  %v63_v7 = vld [vmem:[%s4253_s3 + $0x28] sm:$0xff] }
   0x3   :  { %v3492_v4 = vpack.c.bf16 %v65_v1, %v61_v0  ;;  %v3503_v8 = vpack.c.bf16 %v64_v5, %v60_v2  ;;  %v3505_v9 = vpack.c.bf16 %v63_v7, %v59_v6  ;;  %v69_v10 = vld [vmem:[%s4253_s3 + $0x58] sm:$0xff]  ;;  %v58_v12 = vld [vmem:[%s4253_s3] sm:$0xff]  ;;  %v68_v15 = vld [vmem:[%s4253_s3 + $0x50] sm:$0xff] }
   0x4   :  { %v73_v11 = vld [vmem:[%s4253_s3 + $0x78] sm:$0xff]  ;;  %v62_v14 = vld [vmem:[%s4253_s3 + $0x20] sm:$0xff]  ;;  %v72_v16 = vld [vmem:[%s4253_s3 + $0x70] sm:$0xff] }
   0x5   :  { %2821 = vmatprep.subr.bf16.mxu1 %v3492_v4  ;;  %v3517_v13 = vpack.c.bf16 %v73_v11, %v69_v10  ;;  %2789 = vmatprep.subr.bf16.mxu0 %v3505_v9  ;;  %v3530_v17 = vpack.c.bf16 %v62_v14, %v58_v12  ;;  %v3532_v18 = vpack.c.bf16 %v72_v16, %v68_v15  ;;  %v67_v19 = vld [vmem:[%s4253_s3 + $0x48] sm:$0xff]  ;;  %v77_v21 = vld [vmem:[%s4253_s3 + $0x98] sm:$0xff]  ;;  %v66_v24 = vld [vmem:[%s4253_s3 + $0x40] sm:$0xff] }
   0x6   :  { %2823 = vmatpush1.bf16.msra.mxu1 %v3503_v8  ;;  %v71_v20 = vld [vmem:[%s4253_s3 + $0x68] sm:$0xff]  ;;  %v81_v23 = vld [vmem:[%s4253_s3 + $0xb8] sm:$0xff]  ;;  %v70_v25 = vld [vmem:[%s4253_s3 + $0x60] sm:$0xff] }
   0x7   :  { %2825 = vmatprep.subr.bf16.mxu1 %v3517_v13  ;;  %v3544_v22 = vpack.c.bf16 %v71_v20, %v67_v19  ;;  %2791 = vmatpush1.bf16.msra.mxu0 %v3530_v17  ;;  %v3556_v26 = vpack.c.bf16 %v81_v23, %v77_v21  ;;  %v3558_v27 = vpack.c.bf16 %v70_v25, %v66_v24  ;;  %v76_v28 = vld [vmem:[%s4253_s3 + $0x90] sm:$0xff]  ;;  %v75_v30 = vld [vmem:[%s4253_s3 + $0x88] sm:$0xff]  ;;  %v85_v32 = vld [vmem:[%s4253_s3 + $0xd8] sm:$0xff] }
   0x8   :  { %v80_v29 = vld [vmem:[%s4253_s3 + $0xb0] sm:$0xff]  ;;  %v79_v31 = vld [vmem:[%s4253_s3 + $0xa8] sm:$0xff]  ;;  %v89_v33 = vld [vmem:[%s4253_s3 + $0xf8] sm:$0xff] }
   0x9   :  { %2793 = vmatprep.subr.bf16.mxu0 %v3544_v22  ;;  %v3580_v34 = vpack.c.bf16 %v80_v29, %v76_v28  ;;  %v3582_v35 = vpack.c.bf16 %v79_v31, %v75_v30  ;;  %v74_v36 = vld [vmem:[%s4253_s3 + $0x80] sm:$0xff]  ;;  %v84_v38 = vld [vmem:[%s4253_s3 + $0xd0] sm:$0xff]  ;;  %v3594_v39 = vpack.c.bf16 %v89_v33, %v85_v32  ;;  %v83_v41 = vld [vmem:[%s4253_s3 + $0xc8] sm:$0xff] }
   0xa   :  { %2827 = vmatpush1.bf16.msra.mxu1 %v3532_v18  ;;  %v78_v37 = vld [vmem:[%s4253_s3 + $0xa0] sm:$0xff]  ;;  %v88_v40 = vld [vmem:[%s4253_s3 + $0xf0] sm:$0xff]  ;;  %v87_v42 = vld [vmem:[%s4253_s3 + $0xe8] sm:$0xff] }
   0xb   :  { %2829 = vmatprep.subr.bf16.mxu1 %v3556_v26  ;;  %2795 = vmatpush1.bf16.msra.mxu0 %v3558_v27  ;;  %v3606_v43 = vpack.c.bf16 %v78_v37, %v74_v36  ;;  %v93_v44 = vld [vmem:[%s4253_s3 + $0x118] sm:$0xff]  ;;  %v3615_v46 = vpack.c.bf16 %v87_v42, %v83_v41  ;;  %v82_v47 = vld [vmem:[%s4253_s3 + $0xc0] sm:$0xff]  ;;  %v3624_v49 = vpack.c.bf16 %v88_v40, %v84_v38  ;;  %v91_v50 = vld [vmem:[%s4253_s3 + $0x108] sm:$0xff] }
   0xc   :  { %v97_v45 = vld [vmem:[%s4253_s3 + $0x138] sm:$0xff]  ;;  %2797 = vmatprep.subr.bf16.mxu0 %v3582_v35  ;;  %v86_v48 = vld [vmem:[%s4253_s3 + $0xe0] sm:$0xff]  ;;  %v95_v51 = vld [vmem:[%s4253_s3 + $0x128] sm:$0xff] }
   0xd   :  { %v3633_v52 = vpack.c.bf16 %v97_v45, %v93_v44  ;;  %v92_v53 = vld [vmem:[%s4253_s3 + $0x110] sm:$0xff]  ;;  %v3642_v55 = vpack.c.bf16 %v86_v48, %v82_v47  ;;  %v101_v56 = vld [vmem:[%s4253_s3 + $0x158] sm:$0xff]  ;;  %v3651_v58 = vpack.c.bf16 %v95_v51, %v91_v50  ;;  %v90_v59 = vld [vmem:[%s4253_s3 + $0x100] sm:$0xff] }
   0xe   :  { %2831 = vmatpush1.bf16.msra.mxu1 %v3580_v34  ;;  %v96_v54 = vld [vmem:[%s4253_s3 + $0x130] sm:$0xff]  ;;  %v105_v57 = vld [vmem:[%s4253_s3 + $0x178] sm:$0xff]  ;;  %v94_v60 = vld [vmem:[%s4253_s3 + $0x120] sm:$0xff] }
   0xf   :  { %2833 = vmatprep.subr.bf16.mxu1 %v3594_v39  ;;  %2799 = vmatpush1.bf16.msra.mxu0 %v3606_v43  ;;  %v3660_v61 = vpack.c.bf16 %v96_v54, %v92_v53  ;;  %v99_v62 = vld [vmem:[%s4253_s3 + $0x148] sm:$0xff]  ;;  %v3669_v0 = vpack.c.bf16 %v105_v57, %v101_v56  ;;  %v100_v1 = vld [vmem:[%s4253_s3 + $0x150] sm:$0xff]  ;;  %v3678_v5 = vpack.c.bf16 %v94_v60, %v90_v59  ;;  %v109_v6 = vld [vmem:[%s4253_s3 + $0x198] sm:$0xff]  ;;  %v31_v56 = vlaneseq }
  0x10   :  { %2801 = vmatprep.subr.bf16.mxu0 %v3615_v46  ;;  %v103_v63 = vld [vmem:[%s4253_s3 + $0x168] sm:$0xff]  ;;  %v104_v2 = vld [vmem:[%s4253_s3 + $0x170] sm:$0xff]  ;;  %v113_v7 = vld [vmem:[%s4253_s3 + $0x1b8] sm:$0xff] }
  0x11   :  { %v3687_v10 = vpack.c.bf16 %v103_v63, %v99_v62  ;;  %v98_v11 = vld [vmem:[%s4253_s3 + $0x140] sm:$0xff]  ;;  %v3696_v14 = vpack.c.bf16 %v104_v2, %v100_v1  ;;  %v107_v15 = vld [vmem:[%s4253_s3 + $0x188] sm:$0xff]  ;;  %v3705_v19 = vpack.c.bf16 %v113_v7, %v109_v6  ;;  %v108_v20 = vld [vmem:[%s4253_s3 + $0x190] sm:$0xff]  ;;  %v32_v57 = vshrl.u32 %v31_v56, 7 }
  0x12   :  { %2835 = vmatpush1.bf16.msra.mxu1 %v3624_v49  ;;  %v102_v12 = vld [vmem:[%s4253_s3 + $0x160] sm:$0xff]  ;;  %v111_v16 = vld [vmem:[%s4253_s3 + $0x1a8] sm:$0xff]  ;;  %v112_v21 = vld [vmem:[%s4253_s3 + $0x1b0] sm:$0xff] }
  0x13   :  { %2837 = vmatprep.subr.bf16.mxu1 %v3633_v52  ;;  %2803 = vmatpush1.bf16.msra.mxu0 %v3642_v55  ;;  %v3714_v23 = vpack.c.bf16 %v102_v12, %v98_v11  ;;  %v117_v24 = vld [vmem:[%s4253_s3 + $0x1d8] sm:$0xff]  ;;  %v3723_v28 = vpack.c.bf16 %v111_v16, %v107_v15  ;;  %v106_v29 = vld [vmem:[%s4253_s3 + $0x180] sm:$0xff]  ;;  %v3732_v31 = vpack.c.bf16 %v112_v21, %v108_v20  ;;  %v115_v32 = vld [vmem:[%s4253_s3 + $0x1c8] sm:$0xff]  ;;  %v33_v59 = vsub.s32 0, %v32_v57 }
  0x14   :  { %2805 = vmatprep.subr.bf16.mxu0 %v3651_v58  ;;  %v121_v25 = vld [vmem:[%s4253_s3 + $0x1f8] sm:$0xff]  ;;  %v110_v30 = vld [vmem:[%s4253_s3 + $0x1a0] sm:$0xff]  ;;  %v119_v33 = vld [vmem:[%s4253_s3 + $0x1e8] sm:$0xff]  ;;  %v37_v62 = vsub.s32 1, %v32_v57  ;;  %v41_v6 = vsub.s32 2, %v32_v57 }
  0x15   :  { %v3741_v36 = vpack.c.bf16 %v121_v25, %v117_v24  ;;  %v116_v37 = vld [vmem:[%s4253_s3 + $0x1d0] sm:$0xff]  ;;  %v3750_v40 = vpack.c.bf16 %v110_v30, %v106_v29  ;;  %v3753_v41 = vpack.c.bf16 %v119_v33, %v115_v32  ;;  %v114_v42 = vld [vmem:[%s4253_s3 + $0x1c0] sm:$0xff]  ;;  %v3769_v47 = vld [vmem:[%s4254_s1 + $0x8] sm:$0xff]  ;;  %v45_v24 = vsub.s32 3, %v32_v57 }
  0x16   :  { %2839 = vmatpush1.bf16.msra.mxu1 %v3660_v61  ;;  %v120_v38 = vld [vmem:[%s4253_s3 + $0x1f0] sm:$0xff]  ;;  %v118_v44 = vld [vmem:[%s4253_s3 + $0x1e0] sm:$0xff]  ;;  %v3785_v51 = vld [vmem:[%s4254_s1 + $0x18] sm:$0xff] }
  0x17   :  { %2841 = vmatprep.subr.bf16.mxu1 %v3669_v0  ;;  %2807 = vmatpush1.bf16.msra.mxu0 %v3678_v5  ;;  %v3762_v45 = vpack.c.bf16 %v120_v38, %v116_v37  ;;  %v3771_v48 = vpack.c.bf16 %v118_v44, %v114_v42  ;;  %v3779_v50 = vld [vmem:[%s4254_s1] sm:$0xff]  ;;  %v3799_v54 = vld [vmem:[%s4254_s1 + $0x10] sm:$0xff] }
  0x18   :  { %2809 = vmatprep.subr.bf16.mxu0 %v3687_v10  ;;  %v53_v53 = vld [vmem:[%s4255_s0] sm:$0xff] }
  0x19   :  { %v29_v60 = vld [vmem:[%s4256_s2] sm:$0xf] }
  0x1a   :  { %2843 = vmatpush1.bf16.msra.mxu1 %v3696_v14  ;;  %v3843_v1 = vrot.slane %v29_v60, %v33_v59  ;;  %v3845_v11 = vrot.slane %v29_v60, %v37_v62  ;;  %v3848_v21 = vrot.slane %v29_v60, %v41_v6  ;;  %v3852_v38 = vrot.slane %v29_v60, %v45_v24 }
  0x1b   :  { %2845 = vmatprep.subr.bf16.mxu1 %v3705_v19  ;;  %2811 = vmatpush1.bf16.msra.mxu0 %v3714_v23 }
  0x1c   :  { %2813 = vmatprep.subr.bf16.mxu0 %v3723_v28 }
  0x1e   :  { %2847 = vmatpush1.bf16.msra.mxu1 %v3732_v31 }
  0x1f   :  { %2849 = vmatprep.subr.bf16.mxu1 %v3741_v36  ;;  %2815 = vmatpush1.bf16.msra.mxu0 %v3750_v40 }
  0x20   :  { %2817 = vmatprep.subr.bf16.mxu0 %v3753_v41 }
  0x22   :  { %2851 = vmatpush1.bf16.msra.mxu1 %v3762_v45 }
  0x23   :  { %268 = vmatprep.subr.mxu1 %v3769_v47  ;;  %2819 = vmatpush1.bf16.msra.mxu0 %v3771_v48 }
  0x24   :  { %2853 = vmatprep.subr.bf16.mxu0 %v3505_v9 }
  0x25   :  { %258 = vmatmul.mubr.f32.vlgmr.msra.gmra.mrb[0].mxu1 %v3443_v3 }
  0x26   :  { %269 = vmatpush1.msra.mxu1 %v3779_v50  ;;  %332 = vmatprep.mubr.f32.mxu1 %v3443_v3 }
  0x27   :  { %187 = vmatmul.mubr.f32.vlgmr.msra.gmra.mrb[0].mxu0 %v3443_v3  ;;  %339 = vmatprep.subr.mxu1 %v3785_v51 }
  0x28   :  { %2855 = vmatpush1.bf16.msra.mxu0 %v3530_v17  ;;  %498 = vmatprep.mubr.f32.mxu0 %v3443_v3 }
  0x29   :  { %2712 = vmatmul.mubr.msk.f32.vlgmr.msra.gmra.mrb[2].mxu1 %vm264_vm0, %v53_v53  ;;  %2857 = vmatprep.subr.bf16.mxu0 %v3544_v22 }
  0x2a   :  { %340 = vmatpush1.msra.mxu1 %v3799_v54  ;;  %403 = vmatprep.mubr.f32.mxu1 %v3443_v3 }
  0x2b   :  { %2885 = vmatprep.subr.bf16.mxu1 %v3492_v4 }
  0x2c   :  { %2859 = vmatpush1.bf16.msra.mxu0 %v3558_v27 }
  0x2d   :  { %2713 = vmatmul.mubr.msk.f32.vlgmr.msra.gmra.mrb[0].mxu1 %vm264_vm0, %v53_v53  ;;  %2861 = vmatprep.subr.bf16.mxu0 %v3582_v35 }
  0x2e   :  { %2887 = vmatpush1.bf16.msra.mxu1 %v3503_v8  ;;  %569 = vmatprep.mubr.f32.mxu1 %v3443_v3 }
  0x2f   :  { %2889 = vmatprep.subr.bf16.mxu1 %v3517_v13 }
  0x30   :  { %2863 = vmatpush1.bf16.msra.mxu0 %v3606_v43 }
  0x31   :  { %2865 = vmatprep.subr.bf16.mxu0 %v3615_v46 }
  0x32   :  { %2891 = vmatpush1.bf16.msra.mxu1 %v3532_v18 }
  0x33   :  { %2893 = vmatprep.subr.bf16.mxu1 %v3556_v26 }
  0x34   :  { %2867 = vmatpush1.bf16.msra.mxu0 %v3642_v55 }
  0x35   :  { %2869 = vmatprep.subr.bf16.mxu0 %v3651_v58 }
  0x36   :  { %2895 = vmatpush1.bf16.msra.mxu1 %v3580_v34 }
  0x37   :  { %2897 = vmatprep.subr.bf16.mxu1 %v3594_v39 }
  0x38   :  { %2871 = vmatpush1.bf16.msra.mxu0 %v3678_v5 }
  0x39   :  { %2873 = vmatprep.subr.bf16.mxu0 %v3687_v10 }
  0x3a   :  { %2899 = vmatpush1.bf16.msra.mxu1 %v3624_v49 }
  0x3b   :  { %2901 = vmatprep.subr.bf16.mxu1 %v3633_v52 }
  0x3c   :  { %2875 = vmatpush1.bf16.msra.mxu0 %v3714_v23 }
  0x3d   :  { %2877 = vmatprep.subr.bf16.mxu0 %v3723_v28 }
  0x3e   :  { %2903 = vmatpush1.bf16.msra.mxu1 %v3660_v61 }
  0x3f   :  { %2905 = vmatprep.subr.bf16.mxu1 %v3669_v0 }
  0x40   :  { %2879 = vmatpush1.bf16.msra.mxu0 %v3750_v40 }
  0x41   :  { %2881 = vmatprep.subr.bf16.mxu0 %v3753_v41 }
  0x42   :  { %2907 = vmatpush1.bf16.msra.mxu1 %v3696_v14 }
  0x43   :  { %2909 = vmatprep.subr.bf16.mxu1 %v3705_v19 }
  0x44   :  { %2883 = vmatpush1.bf16.msra.mxu0 %v3771_v48 }
  0x45   :  { %2917 = vmatprep.subr.bf16.mxu0 %v3505_v9 }
  0x46   :  { %2911 = vmatpush1.bf16.msra.mxu1 %v3732_v31 }
  0x47   :  { %2913 = vmatprep.subr.bf16.mxu1 %v3741_v36 }
  0x4a   :  { %2915 = vmatpush1.bf16.msra.mxu1 %v3762_v45 }
  0x4b   :  { %579 = vmatprep.subr.mxu1 %v3769_v47 }
  0xfa   :  { %v188_v63 = vpop.f32.mrb[0].mxu0 }
  0xfb   :  { %v190_v2 = vpop.f32.mrb[1].mxu0 }
  0xfc   :  { %v334_v7 = vpop.f32.mrb[2].mxu1 }
  0xfd   :  { %v335_v12 = vadd.f32 %v334_v7, %v188_v63  ;;  %v336_v15 = vpop.f32.mrb[3].mxu1 }
  0xfe   :  { %v337_v16 = vadd.f32 %v336_v15, %v190_v2 }
  0xff   :  { %v410_v20 = vadd.f32 %v335_v12, %v3843_v1 }
 0x100   :  { %v411_v25 = vadd.f32 %v337_v16, %v3845_v11  ;;  %v405_v29 = vpop.f32.mrb[0].mxu1 }
 0x101   :  { %v414_v30 = vmul.f32 0.5, %v410_v20  ;;  %v407_v32 = vpop.f32.mrb[1].mxu1  ;;  %v412_v37 = vadd.f32 %v405_v29, %v3848_v21 }
 0x102   :  { %v418_v33 = vmul.f32 0.5, %v411_v25  ;;  %v413_v42 = vadd.f32 %v407_v32, %v3852_v38  ;;  %v2714_v25 = vld [vmem:[%s4255_s0 + $0x8] sm:$0xff] }
 0x103   :  { %3359 = vtanh.f32 %v414_v30 }
 0x104   :  { %3361 = vtanh.f32 %v418_v33  ;;  %v423_v44 = vmul.f32 0.5, %v413_v42 }
 0x105   :  { %3363 = vtanh.f32 %v412_v37 }
 0x106   :  { %3365 = vtanh.f32 %v423_v44 }
 0x10d   :  { %v3360_v53 = vpop.eup %3359 }
 0x10e   :  { %v3362_v56 = vpop.eup %3361  ;;  %v416_v59 = vmul.f32 0.5, %v3360_v53 }
 0x10f   :  { %v420_v57 = vmul.f32 0.5, %v3362_v56  ;;  %v3364_v63 = vpop.eup %3363 }
 0x110   :  { %v417_v62 = vadd.f32 0.5, %v416_v59  ;;  %v3366_v60 = vpop.eup %3365 }
 0x111   :  { %v421_v2 = vadd.f32 0.5, %v420_v57  ;;  %v425_v15 = vmul.f32 0.5, %v3366_v60 }
 0x112   :  { %v428_v6 = vmul.f32 %v3364_v63, %v417_v62 }
 0x113   :  { %v427_v7 = vmul.f32 0.0, %v421_v2  ;;  %v426_v16 = vadd.f32 0.5, %v425_v15 }
 0x115   :  { %v3855_v12 = vadd.f32 %v428_v6, %v427_v7 }
 0x117   :  { %3367 = vtanh.f32 %v3855_v12 }
 0x121   :  { %v3368_v20 = vpop.eup %3367 }
 0x122   :  { %v431_v24 = vmul.f32 %v3368_v20, %v426_v16 }
 0x124   :  { %499 = vmatmul.mubr.f32.vlgmr.msra.gmra.mrb[2].mxu0 %v431_v24  ;;  %570 = vmatmul.mubr.f32.vlgmr.msra.gmra.mrb[4].mxu1 %v431_v24 }
 0x125   :  { %580 = vmatpush1.msra.mxu1 %v3779_v50  ;;  %643 = vmatprep.mubr.f32.mxu1 %v3443_v3 }
 0x126   :  { %650 = vmatprep.subr.mxu1 %v3785_v51  ;;  %2919 = vmatpush1.bf16.msra.mxu0 %v3530_v17 }
 0x127   :  { %2921 = vmatprep.subr.bf16.mxu0 %v3544_v22  ;;  %809 = vmatprep.mubr.f32.mxu0 %v3443_v3 }
 0x128   :  { %2715 = vmatmul.mubr.msk.f32.vlgmr.msra.gmra.mrb[6].mxu1 %vm264_vm0, %v2714_v25 }
 0x129   :  { %651 = vmatpush1.msra.mxu1 %v3799_v54  ;;  %714 = vmatprep.mubr.f32.mxu1 %v3443_v3 }
 0x12a   :  { %2949 = vmatprep.subr.bf16.mxu1 %v3492_v4  ;;  %2923 = vmatpush1.bf16.msra.mxu0 %v3558_v27 }
 0x12b   :  { %2925 = vmatprep.subr.bf16.mxu0 %v3582_v35 }
 0x12c   :  { %2716 = vmatmul.mubr.msk.f32.vlgmr.msra.gmra.mrb[4].mxu1 %vm264_vm0, %v2714_v25 }
 0x12d   :  { %2951 = vmatpush1.bf16.msra.mxu1 %v3503_v8  ;;  %880 = vmatprep.mubr.f32.mxu1 %v3443_v3 }
 0x12e   :  { %2953 = vmatprep.subr.bf16.mxu1 %v3517_v13  ;;  %2927 = vmatpush1.bf16.msra.mxu0 %v3606_v43 }
 0x12f   :  { %2929 = vmatprep.subr.bf16.mxu0 %v3615_v46 }
 0x131   :  { %2955 = vmatpush1.bf16.msra.mxu1 %v3532_v18 }
 0x132   :  { %2957 = vmatprep.subr.bf16.mxu1 %v3556_v26  ;;  %2931 = vmatpush1.bf16.msra.mxu0 %v3642_v55 }
 0x133   :  { %2933 = vmatprep.subr.bf16.mxu0 %v3651_v58 }
 0x135   :  { %2959 = vmatpush1.bf16.msra.mxu1 %v3580_v34 }
 0x136   :  { %2961 = vmatprep.subr.bf16.mxu1 %v3594_v39  ;;  %2935 = vmatpush1.bf16.msra.mxu0 %v3678_v5 }
 0x137   :  { %2937 = vmatprep.subr.bf16.mxu0 %v3687_v10 }
 0x139   :  { %2963 = vmatpush1.bf16.msra.mxu1 %v3624_v49 }
 0x13a   :  { %2965 = vmatprep.subr.bf16.mxu1 %v3633_v52  ;;  %2939 = vmatpush1.bf16.msra.mxu0 %v3714_v23 }
 0x13b   :  { %2941 = vmatprep.subr.bf16.mxu0 %v3723_v28 }
 0x13d   :  { %2967 = vmatpush1.bf16.msra.mxu1 %v3660_v61 }
 0x13e   :  { %2969 = vmatprep.subr.bf16.mxu1 %v3669_v0  ;;  %2943 = vmatpush1.bf16.msra.mxu0 %v3750_v40 }
 0x13f   :  { %2945 = vmatprep.subr.bf16.mxu0 %v3753_v41 }
 0x141   :  { %2971 = vmatpush1.bf16.msra.mxu1 %v3696_v14 }
 0x142   :  { %2973 = vmatprep.subr.bf16.mxu1 %v3705_v19  ;;  %2947 = vmatpush1.bf16.msra.mxu0 %v3771_v48 }
 0x143   :  { %2981 = vmatprep.subr.bf16.mxu0 %v3505_v9 }
 0x145   :  { %2975 = vmatpush1.bf16.msra.mxu1 %v3732_v31 }
 0x146   :  { %2977 = vmatprep.subr.bf16.mxu1 %v3741_v36 }
 0x149   :  { %2979 = vmatpush1.bf16.msra.mxu1 %v3762_v45 }
 0x14a   :  { %890 = vmatprep.subr.mxu1 %v3769_v47 }
 0x1f7   :  { %v500_v29 = vpop.f32.mrb[2].mxu0 }
 0x1f8   :  { %v502_v30 = vpop.f32.mrb[3].mxu0 }
 0x1fb   :  { %v645_v32 = vpop.f32.mrb[6].mxu1 }
 0x1fc   :  { %v646_v33 = vadd.f32 %v645_v32, %v500_v29  ;;  %v647_v37 = vpop.f32.mrb[7].mxu1 }
 0x1fd   :  { %v648_v42 = vadd.f32 %v647_v37, %v502_v30 }
 0x1fe   :  { %v721_v44 = vadd.f32 %v646_v33, %v3843_v1 }
 0x1ff   :  { %v722_v53 = vadd.f32 %v648_v42, %v3845_v11  ;;  %v716_v56 = vpop.f32.mrb[4].mxu1 }
 0x200   :  { %v725_v59 = vmul.f32 0.5, %v721_v44  ;;  %v718_v57 = vpop.f32.mrb[5].mxu1  ;;  %v723_v63 = vadd.f32 %v716_v56, %v3848_v21  ;;  %v2717_v56 = vld [vmem:[%s4255_s0 + $0x10] sm:$0xff] }
 0x201   :  { %v729_v62 = vmul.f32 0.5, %v722_v53  ;;  %v724_v2 = vadd.f32 %v718_v57, %v3852_v38 }
 0x202   :  { %3369 = vtanh.f32 %v725_v59 }
 0x203   :  { %3371 = vtanh.f32 %v729_v62  ;;  %v734_v6 = vmul.f32 0.5, %v724_v2 }
 0x204   :  { %3373 = vtanh.f32 %v723_v63 }
 0x205   :  { %3375 = vtanh.f32 %v734_v6 }
 0x20c   :  { %v3370_v7 = vpop.eup %3369 }
 0x20d   :  { %v3372_v60 = vpop.eup %3371  ;;  %v727_v15 = vmul.f32 0.5, %v3370_v7 }
 0x20e   :  { %v731_v16 = vmul.f32 0.5, %v3372_v60  ;;  %v3374_v24 = vpop.eup %3373 }
 0x20f   :  { %v728_v20 = vadd.f32 0.5, %v727_v15  ;;  %v3376_v33 = vpop.eup %3375 }
 0x210   :  { %v732_v25 = vadd.f32 0.5, %v731_v16  ;;  %v736_v37 = vmul.f32 0.5, %v3376_v33 }
 0x211   :  { %v739_v29 = vmul.f32 %v3374_v24, %v728_v20 }
 0x212   :  { %v738_v30 = vmul.f32 %v732_v25, %v3855_v12  ;;  %v737_v42 = vadd.f32 0.5, %v736_v37 }
 0x214   :  { %v3908_v32 = vadd.f32 %v739_v29, %v738_v30 }
 0x216   :  { %3377 = vtanh.f32 %v3908_v32 }
 0x220   :  { %v3378_v44 = vpop.eup %3377 }
 0x221   :  { %v742_v53 = vmul.f32 %v3378_v44, %v737_v42 }
 0x223   :  { %810 = vmatmul.mubr.f32.vlgmr.msra.gmra.mrb[4].mxu0 %v742_v53  ;;  %881 = vmatmul.mubr.f32.vlgmr.msra.gmra.mrb[8].mxu1 %v742_v53 }
 0x224   :  { %891 = vmatpush1.msra.mxu1 %v3779_v50  ;;  %954 = vmatprep.mubr.f32.mxu1 %v3443_v3 }
 0x225   :  { %961 = vmatprep.subr.mxu1 %v3785_v51  ;;  %2983 = vmatpush1.bf16.msra.mxu0 %v3530_v17 }
 0x226   :  { %2985 = vmatprep.subr.bf16.mxu0 %v3544_v22  ;;  %1120 = vmatprep.mubr.f32.mxu0 %v3443_v3 }
 0x227   :  { %2718 = vmatmul.mubr.msk.f32.vlgmr.msra.gmra.mrb[10].mxu1 %vm264_vm0, %v2717_v56 }
 0x228   :  { %962 = vmatpush1.msra.mxu1 %v3799_v54  ;;  %1025 = vmatprep.mubr.f32.mxu1 %v3443_v3 }
 0x229   :  { %3013 = vmatprep.subr.bf16.mxu1 %v3492_v4  ;;  %2987 = vmatpush1.bf16.msra.mxu0 %v3558_v27 }
 0x22a   :  { %2989 = vmatprep.subr.bf16.mxu0 %v3582_v35 }
 0x22b   :  { %2719 = vmatmul.mubr.msk.f32.vlgmr.msra.gmra.mrb[8].mxu1 %vm264_vm0, %v2717_v56 }
 0x22c   :  { %3015 = vmatpush1.bf16.msra.mxu1 %v3503_v8  ;;  %1191 = vmatprep.mubr.f32.mxu1 %v3443_v3 }
 0x22d   :  { %3017 = vmatprep.subr.bf16.mxu1 %v3517_v13  ;;  %2991 = vmatpush1.bf16.msra.mxu0 %v3606_v43 }
 0x22e   :  { %2993 = vmatprep.subr.bf16.mxu0 %v3615_v46 }
 0x230   :  { %3019 = vmatpush1.bf16.msra.mxu1 %v3532_v18 }
 0x231   :  { %3021 = vmatprep.subr.bf16.mxu1 %v3556_v26  ;;  %2995 = vmatpush1.bf16.msra.mxu0 %v3642_v55 }
 0x232   :  { %2997 = vmatprep.subr.bf16.mxu0 %v3651_v58 }
 0x234   :  { %3023 = vmatpush1.bf16.msra.mxu1 %v3580_v34 }
 0x235   :  { %3025 = vmatprep.subr.bf16.mxu1 %v3594_v39  ;;  %2999 = vmatpush1.bf16.msra.mxu0 %v3678_v5 }
 0x236   :  { %3001 = vmatprep.subr.bf16.mxu0 %v3687_v10 }
 0x238   :  { %3027 = vmatpush1.bf16.msra.mxu1 %v3624_v49 }
 0x239   :  { %3029 = vmatprep.subr.bf16.mxu1 %v3633_v52  ;;  %3003 = vmatpush1.bf16.msra.mxu0 %v3714_v23 }
 0x23a   :  { %3005 = vmatprep.subr.bf16.mxu0 %v3723_v28 }
 0x23c   :  { %3031 = vmatpush1.bf16.msra.mxu1 %v3660_v61 }
 0x23d   :  { %3033 = vmatprep.subr.bf16.mxu1 %v3669_v0  ;;  %3007 = vmatpush1.bf16.msra.mxu0 %v3750_v40 }
 0x23e   :  { %3009 = vmatprep.subr.bf16.mxu0 %v3753_v41 }
 0x240   :  { %3035 = vmatpush1.bf16.msra.mxu1 %v3696_v14 }
 0x241   :  { %3037 = vmatprep.subr.bf16.mxu1 %v3705_v19  ;;  %3011 = vmatpush1.bf16.msra.mxu0 %v3771_v48 }
 0x242   :  { %3045 = vmatprep.subr.bf16.mxu0 %v3505_v9 }
 0x244   :  { %3039 = vmatpush1.bf16.msra.mxu1 %v3732_v31 }
 0x245   :  { %3041 = vmatprep.subr.bf16.mxu1 %v3741_v36 }
 0x248   :  { %3043 = vmatpush1.bf16.msra.mxu1 %v3762_v45 }
 0x249   :  { %1201 = vmatprep.subr.mxu1 %v3769_v47 }
 0x2f6   :  { %v811_v12 = vpop.f32.mrb[4].mxu0 }
 0x2f7   :  { %v813_v59 = vpop.f32.mrb[5].mxu0 }
 0x2fa   :  { %v956_v57 = vpop.f32.mrb[10].mxu1 }
 0x2fb   :  { %v957_v62 = vadd.f32 %v956_v57, %v811_v12  ;;  %v958_v63 = vpop.f32.mrb[11].mxu1 }
 0x2fc   :  { %v959_v2 = vadd.f32 %v958_v63, %v813_v59 }
 0x2fd   :  { %v1032_v6 = vadd.f32 %v957_v62, %v3843_v1 }
 0x2fe   :  { %v1033_v7 = vadd.f32 %v959_v2, %v3845_v11  ;;  %v1027_v60 = vpop.f32.mrb[8].mxu1 }
 0x2ff   :  { %v1036_v15 = vmul.f32 0.5, %v1032_v6  ;;  %v1029_v16 = vpop.f32.mrb[9].mxu1  ;;  %v1034_v24 = vadd.f32 %v1027_v60, %v3848_v21  ;;  %v2720_v60 = vld [vmem:[%s4255_s0 + $0x18] sm:$0xff] }
 0x300   :  { %v1040_v20 = vmul.f32 0.5, %v1033_v7  ;;  %v1035_v25 = vadd.f32 %v1029_v16, %v3852_v38 }
 0x301   :  { %3379 = vtanh.f32 %v1036_v15 }
 0x302   :  { %3381 = vtanh.f32 %v1040_v20  ;;  %v1045_v29 = vmul.f32 0.5, %v1035_v25 }
 0x303   :  { %3383 = vtanh.f32 %v1034_v24 }
 0x304   :  { %3385 = vtanh.f32 %v1045_v29 }
 0x30b   :  { %v3380_v30 = vpop.eup %3379 }
 0x30c   :  { %v3382_v33 = vpop.eup %3381  ;;  %v1038_v37 = vmul.f32 0.5, %v3380_v30 }
 0x30d   :  { %v1042_v42 = vmul.f32 0.5, %v3382_v33  ;;  %v3384_v53 = vpop.eup %3383 }
 0x30e   :  { %v1039_v44 = vadd.f32 0.5, %v1038_v37  ;;  %v3386_v62 = vpop.eup %3385 }
 0x30f   :  { %v1043_v56 = vadd.f32 0.5, %v1042_v42  ;;  %v1047_v63 = vmul.f32 0.5, %v3386_v62 }
 0x310   :  { %v1050_v12 = vmul.f32 %v3384_v53, %v1039_v44 }
 0x311   :  { %v1049_v59 = vmul.f32 %v1043_v56, %v3908_v32  ;;  %v1048_v2 = vadd.f32 0.5, %v1047_v63 }
 0x313   :  { %v3961_v57 = vadd.f32 %v1050_v12, %v1049_v59 }
 0x315   :  { %3387 = vtanh.f32 %v3961_v57 }
 0x31f   :  { %v3388_v6 = vpop.eup %3387 }
 0x320   :  { %v1053_v7 = vmul.f32 %v3388_v6, %v1048_v2 }
 0x322   :  { %1121 = vmatmul.mubr.f32.vlgmr.msra.gmra.mrb[6].mxu0 %v1053_v7  ;;  %1192 = vmatmul.mubr.f32.vlgmr.msra.gmra.mrb[12].mxu1 %v1053_v7 }
 0x323   :  { %1202 = vmatpush1.msra.mxu1 %v3779_v50  ;;  %1265 = vmatprep.mubr.f32.mxu1 %v3443_v3 }
 0x324   :  { %1272 = vmatprep.subr.mxu1 %v3785_v51  ;;  %3047 = vmatpush1.bf16.msra.mxu0 %v3530_v17 }
 0x325   :  { %3049 = vmatprep.subr.bf16.mxu0 %v3544_v22  ;;  %1431 = vmatprep.mubr.f32.mxu0 %v3443_v3 }
 0x326   :  { %2721 = vmatmul.mubr.msk.f32.vlgmr.msra.gmra.mrb[14].mxu1 %vm264_vm0, %v2720_v60 }
 0x327   :  { %1273 = vmatpush1.msra.mxu1 %v3799_v54  ;;  %1336 = vmatprep.mubr.f32.mxu1 %v3443_v3 }
 0x328   :  { %3077 = vmatprep.subr.bf16.mxu1 %v3492_v4  ;;  %3051 = vmatpush1.bf16.msra.mxu0 %v3558_v27 }
 0x329   :  { %3053 = vmatprep.subr.bf16.mxu0 %v3582_v35 }
 0x32a   :  { %2722 = vmatmul.mubr.msk.f32.vlgmr.msra.gmra.mrb[12].mxu1 %vm264_vm0, %v2720_v60 }
 0x32b   :  { %3079 = vmatpush1.bf16.msra.mxu1 %v3503_v8  ;;  %1502 = vmatprep.mubr.f32.mxu1 %v3443_v3 }
 0x32c   :  { %3081 = vmatprep.subr.bf16.mxu1 %v3517_v13  ;;  %3055 = vmatpush1.bf16.msra.mxu0 %v3606_v43 }
 0x32d   :  { %3057 = vmatprep.subr.bf16.mxu0 %v3615_v46 }
 0x32f   :  { %3083 = vmatpush1.bf16.msra.mxu1 %v3532_v18 }
 0x330   :  { %3085 = vmatprep.subr.bf16.mxu1 %v3556_v26  ;;  %3059 = vmatpush1.bf16.msra.mxu0 %v3642_v55 }
 0x331   :  { %3061 = vmatprep.subr.bf16.mxu0 %v3651_v58 }
 0x333   :  { %3087 = vmatpush1.bf16.msra.mxu1 %v3580_v34 }
 0x334   :  { %3089 = vmatprep.subr.bf16.mxu1 %v3594_v39  ;;  %3063 = vmatpush1.bf16.msra.mxu0 %v3678_v5 }
 0x335   :  { %3065 = vmatprep.subr.bf16.mxu0 %v3687_v10 }
 0x337   :  { %3091 = vmatpush1.bf16.msra.mxu1 %v3624_v49 }
 0x338   :  { %3093 = vmatprep.subr.bf16.mxu1 %v3633_v52  ;;  %3067 = vmatpush1.bf16.msra.mxu0 %v3714_v23 }
 0x339   :  { %3069 = vmatprep.subr.bf16.mxu0 %v3723_v28 }
 0x33b   :  { %3095 = vmatpush1.bf16.msra.mxu1 %v3660_v61 }
 0x33c   :  { %3097 = vmatprep.subr.bf16.mxu1 %v3669_v0  ;;  %3071 = vmatpush1.bf16.msra.mxu0 %v3750_v40 }
 0x33d   :  { %3073 = vmatprep.subr.bf16.mxu0 %v3753_v41 }
 0x33f   :  { %3099 = vmatpush1.bf16.msra.mxu1 %v3696_v14 }
 0x340   :  { %3101 = vmatprep.subr.bf16.mxu1 %v3705_v19  ;;  %3075 = vmatpush1.bf16.msra.mxu0 %v3771_v48 }
 0x341   :  { %1512 = vmatprep.subr.mxu0 %v3769_v47 }
 0x343   :  { %3103 = vmatpush1.bf16.msra.mxu1 %v3732_v31 }
 0x344   :  { %3105 = vmatprep.subr.bf16.mxu1 %v3741_v36 }
 0x347   :  { %3107 = vmatpush1.bf16.msra.mxu1 %v3762_v45 }
 0x348   :  { %1583 = vmatprep.subr.mxu1 %v3785_v51 }
 0x3f5   :  { %v1122_v32 = vpop.f32.mrb[6].mxu0 }
 0x3f6   :  { %v1124_v15 = vpop.f32.mrb[7].mxu0 }
 0x3f9   :  { %v1267_v16 = vpop.f32.mrb[14].mxu1 }
 0x3fa   :  { %v1268_v20 = vadd.f32 %v1267_v16, %v1122_v32  ;;  %v1269_v24 = vpop.f32.mrb[15].mxu1 }
 0x3fb   :  { %v1270_v25 = vadd.f32 %v1269_v24, %v1124_v15 }
 0x3fc   :  { %v1343_v29 = vadd.f32 %v1268_v20, %v3843_v1 }
 0x3fd   :  { %v1344_v30 = vadd.f32 %v1270_v25, %v3845_v11  ;;  %v1338_v33 = vpop.f32.mrb[12].mxu1 }
 0x3fe   :  { %v1347_v37 = vmul.f32 0.5, %v1343_v29  ;;  %v1340_v42 = vpop.f32.mrb[13].mxu1  ;;  %v1345_v53 = vadd.f32 %v1338_v33, %v3848_v21 }
 0x3ff   :  { %v1351_v44 = vmul.f32 0.5, %v1344_v30  ;;  %v1346_v56 = vadd.f32 %v1340_v42, %v3852_v38 }
 0x400   :  { %3389 = vtanh.f32 %v1347_v37 }
 0x401   :  { %3391 = vtanh.f32 %v1351_v44  ;;  %v1356_v12 = vmul.f32 0.5, %v1346_v56 }
 0x402   :  { %3393 = vtanh.f32 %v1345_v53 }
 0x403   :  { %3395 = vtanh.f32 %v1356_v12 }
 0x40a   :  { %v3390_v59 = vpop.eup %3389 }
 0x40b   :  { %v3392_v62 = vpop.eup %3391  ;;  %v1349_v63 = vmul.f32 0.5, %v3390_v59 }
 0x40c   :  { %v1353_v2 = vmul.f32 0.5, %v3392_v62  ;;  %v3394_v7 = vpop.eup %3393 }
 0x40d   :  { %v1350_v6 = vadd.f32 0.5, %v1349_v63  ;;  %v3396_v20 = vpop.eup %3395 }
 0x40e   :  { %v1354_v60 = vadd.f32 0.5, %v1353_v2  ;;  %v1358_v24 = vmul.f32 0.5, %v3396_v20 }
 0x40f   :  { %v1361_v32 = vmul.f32 %v3394_v7, %v1350_v6 }
 0x410   :  { %v1360_v15 = vmul.f32 %v1354_v60, %v3961_v57  ;;  %v1359_v25 = vadd.f32 0.5, %v1358_v24  ;;  %v2723_v57 = vld [vmem:[%s4255_s0 + $0x20] sm:$0xff] }
 0x412   :  { %v4014_v16 = vadd.f32 %v1361_v32, %v1360_v15 }
 0x414   :  { %3397 = vtanh.f32 %v4014_v16 }
 0x41e   :  { %v3398_v29 = vpop.eup %3397 }
 0x41f   :  { %v1364_v30 = vmul.f32 %v3398_v29, %v1359_v25 }
 0x421   :  { %1432 = vmatmul.mubr.f32.vlgmr.msra.gmra.mrb[8].mxu0 %v1364_v30  ;;  %1503 = vmatmul.mubr.f32.vlgmr.msra.gmra.mrb[16].mxu1 %v1364_v30 }
 0x422   :  { %1513 = vmatpush1.msra.mxu0 %v3779_v50  ;;  %1576 = vmatprep.mubr.f32.mxu0 %v3443_v3 }
 0x423   :  { %1584 = vmatpush1.msra.mxu1 %v3799_v54  ;;  %1647 = vmatprep.mubr.f32.mxu1 %v3443_v3 }
 0x424   :  { %3109 = vmatprep.subr.bf16.mxu0 %v3505_v9  ;;  %3141 = vmatprep.subr.bf16.mxu1 %v3492_v4 }
 0x429   :  { %2724 = vmatmul.mubr.msk.f32.vlgmr.msra.gmra.mrb[8].mxu0 %vm264_vm0, %v2723_v57  ;;  %2725 = vmatmul.mubr.msk.f32.vlgmr.msra.gmra.mrb[16].mxu1 %vm264_vm0, %v2723_v57 }
 0x42a   :  { %3111 = vmatpush1.bf16.msra.mxu0 %v3530_v17  ;;  %3143 = vmatpush1.bf16.msra.mxu1 %v3503_v8 }
 0x42b   :  { %3113 = vmatprep.subr.bf16.mxu0 %v3544_v22  ;;  %3145 = vmatprep.subr.bf16.mxu1 %v3517_v13 }
 0x42c   :  { %1742 = vmatprep.mubr.f32.mxu0 %v3443_v3  ;;  %1813 = vmatprep.mubr.f32.mxu1 %v3443_v3 }
 0x42e   :  { %3115 = vmatpush1.bf16.msra.mxu0 %v3558_v27  ;;  %3147 = vmatpush1.bf16.msra.mxu1 %v3532_v18 }
 0x42f   :  { %3117 = vmatprep.subr.bf16.mxu0 %v3582_v35  ;;  %3149 = vmatprep.subr.bf16.mxu1 %v3556_v26 }
 0x432   :  { %3119 = vmatpush1.bf16.msra.mxu0 %v3606_v43  ;;  %3151 = vmatpush1.bf16.msra.mxu1 %v3580_v34 }
 0x433   :  { %3121 = vmatprep.subr.bf16.mxu0 %v3615_v46  ;;  %3153 = vmatprep.subr.bf16.mxu1 %v3594_v39 }
 0x436   :  { %3123 = vmatpush1.bf16.msra.mxu0 %v3642_v55  ;;  %3155 = vmatpush1.bf16.msra.mxu1 %v3624_v49 }
 0x437   :  { %3125 = vmatprep.subr.bf16.mxu0 %v3651_v58  ;;  %3157 = vmatprep.subr.bf16.mxu1 %v3633_v52 }
 0x43a   :  { %3127 = vmatpush1.bf16.msra.mxu0 %v3678_v5  ;;  %3159 = vmatpush1.bf16.msra.mxu1 %v3660_v61 }
 0x43b   :  { %3129 = vmatprep.subr.bf16.mxu0 %v3687_v10  ;;  %3161 = vmatprep.subr.bf16.mxu1 %v3669_v0 }
 0x43e   :  { %3131 = vmatpush1.bf16.msra.mxu0 %v3714_v23  ;;  %3163 = vmatpush1.bf16.msra.mxu1 %v3696_v14 }
 0x43f   :  { %3133 = vmatprep.subr.bf16.mxu0 %v3723_v28  ;;  %3165 = vmatprep.subr.bf16.mxu1 %v3705_v19 }
 0x442   :  { %3135 = vmatpush1.bf16.msra.mxu0 %v3750_v40  ;;  %3167 = vmatpush1.bf16.msra.mxu1 %v3732_v31 }
 0x443   :  { %3137 = vmatprep.subr.bf16.mxu0 %v3753_v41  ;;  %3169 = vmatprep.subr.bf16.mxu1 %v3741_v36 }
 0x446   :  { %3139 = vmatpush1.bf16.msra.mxu0 %v3771_v48  ;;  %3171 = vmatpush1.bf16.msra.mxu1 %v3762_v45 }
 0x447   :  { %1823 = vmatprep.subr.mxu0 %v3769_v47  ;;  %1894 = vmatprep.subr.mxu1 %v3785_v51 }
 0x4fc   :  { %v1578_v33 = vpop.f32.mrb[8].mxu0  ;;  %v1649_v37 = vpop.f32.mrb[16].mxu1 }
 0x4fd   :  { %v1654_v42 = vadd.f32 %v1578_v33, %v3843_v1  ;;  %v1580_v44 = vpop.f32.mrb[9].mxu0  ;;  %v1651_v53 = vpop.f32.mrb[17].mxu1  ;;  %v1656_v62 = vadd.f32 %v1649_v37, %v3848_v21 }
 0x4fe   :  { %v1655_v56 = vadd.f32 %v1580_v44, %v3845_v11  ;;  %v1657_v63 = vadd.f32 %v1651_v53, %v3852_v38 }
 0x4ff   :  { %v1658_v12 = vmul.f32 0.5, %v1654_v42 }
 0x500   :  { %v1662_v59 = vmul.f32 0.5, %v1655_v56  ;;  %v1667_v2 = vmul.f32 0.5, %v1657_v63 }
 0x501   :  { %3399 = vtanh.f32 %v1658_v12 }
 0x502   :  { %3401 = vtanh.f32 %v1662_v59 }
 0x503   :  { %3403 = vtanh.f32 %v1656_v62 }
 0x504   :  { %3405 = vtanh.f32 %v1667_v2 }
 0x50b   :  { %v3400_v6 = vpop.eup %3399 }
 0x50c   :  { %v3402_v7 = vpop.eup %3401  ;;  %v1660_v60 = vmul.f32 0.5, %v3400_v6 }
 0x50d   :  { %v1664_v32 = vmul.f32 0.5, %v3402_v7  ;;  %v3404_v20 = vpop.eup %3403 }
 0x50e   :  { %v1661_v15 = vadd.f32 0.5, %v1660_v60  ;;  %v3406_v57 = vpop.eup %3405 }
 0x50f   :  { %v1665_v24 = vadd.f32 0.5, %v1664_v32  ;;  %v1669_v33 = vmul.f32 0.5, %v3406_v57 }
 0x510   :  { %v1672_v25 = vmul.f32 %v3404_v20, %v1661_v15 }
 0x511   :  { %v1671_v29 = vmul.f32 %v1665_v24, %v4014_v16  ;;  %v1670_v37 = vadd.f32 0.5, %v1669_v33  ;;  %v2726_v16 = vld [vmem:[%s4255_s0 + $0x28] sm:$0xff] }
 0x513   :  { %v4067_v30 = vadd.f32 %v1672_v25, %v1671_v29 }
 0x515   :  { %3407 = vtanh.f32 %v4067_v30 }
 0x51f   :  { %v3408_v42 = vpop.eup %3407 }
 0x520   :  { %v1675_v44 = vmul.f32 %v3408_v42, %v1670_v37 }
 0x522   :  { %1743 = vmatmul.mubr.f32.vlgmr.msra.gmra.mrb[10].mxu0 %v1675_v44  ;;  %1814 = vmatmul.mubr.f32.vlgmr.msra.gmra.mrb[18].mxu1 %v1675_v44 }
 0x523   :  { %1824 = vmatpush1.msra.mxu0 %v3779_v50  ;;  %1887 = vmatprep.mubr.f32.mxu0 %v3443_v3 }
 0x524   :  { %1895 = vmatpush1.msra.mxu1 %v3799_v54  ;;  %1958 = vmatprep.mubr.f32.mxu1 %v3443_v3 }
 0x525   :  { %3173 = vmatprep.subr.bf16.mxu0 %v3505_v9  ;;  %3205 = vmatprep.subr.bf16.mxu1 %v3492_v4 }
 0x52a   :  { %2727 = vmatmul.mubr.msk.f32.vlgmr.msra.gmra.mrb[10].mxu0 %vm264_vm0, %v2726_v16  ;;  %2728 = vmatmul.mubr.msk.f32.vlgmr.msra.gmra.mrb[18].mxu1 %vm264_vm0, %v2726_v16 }
 0x52b   :  { %3175 = vmatpush1.bf16.msra.mxu0 %v3530_v17  ;;  %3207 = vmatpush1.bf16.msra.mxu1 %v3503_v8 }
 0x52c   :  { %3177 = vmatprep.subr.bf16.mxu0 %v3544_v22  ;;  %3209 = vmatprep.subr.bf16.mxu1 %v3517_v13 }
 0x52d   :  { %2053 = vmatprep.mubr.f32.mxu0 %v3443_v3  ;;  %2124 = vmatprep.mubr.f32.mxu1 %v3443_v3 }
 0x52f   :  { %3179 = vmatpush1.bf16.msra.mxu0 %v3558_v27  ;;  %3211 = vmatpush1.bf16.msra.mxu1 %v3532_v18 }
 0x530   :  { %3181 = vmatprep.subr.bf16.mxu0 %v3582_v35  ;;  %3213 = vmatprep.subr.bf16.mxu1 %v3556_v26 }
 0x533   :  { %3183 = vmatpush1.bf16.msra.mxu0 %v3606_v43  ;;  %3215 = vmatpush1.bf16.msra.mxu1 %v3580_v34 }
 0x534   :  { %3185 = vmatprep.subr.bf16.mxu0 %v3615_v46  ;;  %3217 = vmatprep.subr.bf16.mxu1 %v3594_v39 }
 0x537   :  { %3187 = vmatpush1.bf16.msra.mxu0 %v3642_v55  ;;  %3219 = vmatpush1.bf16.msra.mxu1 %v3624_v49 }
 0x538   :  { %3189 = vmatprep.subr.bf16.mxu0 %v3651_v58  ;;  %3221 = vmatprep.subr.bf16.mxu1 %v3633_v52 }
 0x53b   :  { %3191 = vmatpush1.bf16.msra.mxu0 %v3678_v5  ;;  %3223 = vmatpush1.bf16.msra.mxu1 %v3660_v61 }
 0x53c   :  { %3193 = vmatprep.subr.bf16.mxu0 %v3687_v10  ;;  %3225 = vmatprep.subr.bf16.mxu1 %v3669_v0 }
 0x53f   :  { %3195 = vmatpush1.bf16.msra.mxu0 %v3714_v23  ;;  %3227 = vmatpush1.bf16.msra.mxu1 %v3696_v14 }
 0x540   :  { %3197 = vmatprep.subr.bf16.mxu0 %v3723_v28  ;;  %3229 = vmatprep.subr.bf16.mxu1 %v3705_v19 }
 0x543   :  { %3199 = vmatpush1.bf16.msra.mxu0 %v3750_v40  ;;  %3231 = vmatpush1.bf16.msra.mxu1 %v3732_v31 }
 0x544   :  { %3201 = vmatprep.subr.bf16.mxu0 %v3753_v41  ;;  %3233 = vmatprep.subr.bf16.mxu1 %v3741_v36 }
 0x547   :  { %3203 = vmatpush1.bf16.msra.mxu0 %v3771_v48  ;;  %3235 = vmatpush1.bf16.msra.mxu1 %v3762_v45 }
 0x548   :  { %2134 = vmatprep.subr.mxu0 %v3769_v47  ;;  %2205 = vmatprep.subr.mxu1 %v3785_v51 }
 0x5fd   :  { %v1889_v53 = vpop.f32.mrb[10].mxu0  ;;  %v1960_v56 = vpop.f32.mrb[18].mxu1 }
 0x5fe   :  { %v1965_v12 = vadd.f32 %v1889_v53, %v3843_v1  ;;  %v1891_v59 = vpop.f32.mrb[11].mxu0  ;;  %v1962_v62 = vpop.f32.mrb[19].mxu1  ;;  %v1967_v7 = vadd.f32 %v1960_v56, %v3848_v21 }
 0x5ff   :  { %v1966_v63 = vadd.f32 %v1891_v59, %v3845_v11  ;;  %v1968_v60 = vadd.f32 %v1962_v62, %v3852_v38  ;;  %v2616_v59 = vld [vmem:[%s4257_s4 + $0x10] sm:$0xff]  ;;  %v2617_v62 = vld [vmem:[%s4257_s4 + $0x18] sm:$0xff] }
 0x600   :  { %v1969_v2 = vmul.f32 0.5, %v1965_v12  ;;  %v3444_v12 = vmov 0.0|0.0  }
 0x601   :  { %v1973_v6 = vmul.f32 0.5, %v1966_v63  ;;  %v1978_v47 = vmul.f32 0.5, %v1968_v60  ;;  %v3304_v63 = vpack.c.bf16 %v2617_v62, %v2616_v59  ;;  %v2620_v60 = vld [vmem:[%s4257_s4 + $0x30] sm:$0xff] }
 0x602   :  { %3409 = vtanh.f32 %v1969_v2  ;;  %v2618_v2 = vld [vmem:[%s4257_s4 + $0x20] sm:$0xff] }
 0x603   :  { %3411 = vtanh.f32 %v1973_v6  ;;  %v2619_v6 = vld [vmem:[%s4257_s4 + $0x28] sm:$0xff] }
 0x604   :  { %3413 = vtanh.f32 %v1967_v7  ;;  %v3307_v7 = vpack.c.bf16 %v2619_v6, %v2618_v2 }
 0x605   :  { %3415 = vtanh.f32 %v1978_v47  ;;  %v2621_v47 = vld [vmem:[%s4257_s4 + $0x38] sm:$0xff] }
 0x60c   :  { %v3410_v32 = vpop.eup %3409 }
 0x60d   :  { %v3412_v51 = vpop.eup %3411  ;;  %v1971_v15 = vmul.f32 0.5, %v3410_v32  ;;  %v3310_v32 = vpack.c.bf16 %v2621_v47, %v2620_v60 }
 0x60e   :  { %v1975_v20 = vmul.f32 0.5, %v3412_v51  ;;  %v3414_v25 = vpop.eup %3413  ;;  %v2622_v51 = vld [vmem:[%s4257_s4 + $0x40] sm:$0xff] }
 0x60f   :  { %v1972_v24 = vadd.f32 0.5, %v1971_v15  ;;  %v3416_v42 = vpop.eup %3415  ;;  %v2623_v15 = vld [vmem:[%s4257_s4 + $0x48] sm:$0xff] }
 0x610   :  { %v1976_v29 = vadd.f32 0.5, %v1975_v20  ;;  %v1980_v44 = vmul.f32 0.5, %v3416_v42  ;;  %v3313_v20 = vpack.c.bf16 %v2623_v15, %v2622_v51  ;;  %v2628_v42 = vld [vmem:[%s4257_s4 + $0x70] sm:$0xff] }
 0x611   :  { %v1983_v57 = vmul.f32 %v3414_v25, %v1972_v24  ;;  %v2624_v24 = vld [vmem:[%s4257_s4 + $0x50] sm:$0xff]  ;;  %v2625_v25 = vld [vmem:[%s4257_s4 + $0x58] sm:$0xff] }
 0x612   :  { %v1982_v33 = vmul.f32 %v1976_v29, %v4067_v30  ;;  %v1981_v16 = vadd.f32 0.5, %v1980_v44  ;;  %v2729_v30 = vld [vmem:[%s4255_s0 + $0x30] sm:$0xff]  ;;  %v3316_v29 = vpack.c.bf16 %v2625_v25, %v2624_v24  ;;  %v2629_v44 = vld [vmem:[%s4257_s4 + $0x78] sm:$0xff] }
 0x614   :  { %v4120_v37 = vadd.f32 %v1983_v57, %v1982_v33  ;;  %v2626_v57 = vld [vmem:[%s4257_s4 + $0x60] sm:$0xff]  ;;  %v2627_v33 = vld [vmem:[%s4257_s4 + $0x68] sm:$0xff] }
 0x616   :  { %3417 = vtanh.f32 %v4120_v37 }
 0x620   :  { %v3418_v53 = vpop.eup %3417 }
 0x621   :  { %v1986_v56 = vmul.f32 %v3418_v53, %v1981_v16  ;;  %v3322_v16 = vpack.c.bf16 %v2629_v44, %v2628_v42 }
 0x623   :  { %2054 = vmatmul.mubr.f32.vlgmr.msra.gmra.mrb[12].mxu0 %v1986_v56  ;;  %2125 = vmatmul.mubr.f32.vlgmr.msra.gmra.mrb[20].mxu1 %v1986_v56 }
 0x624   :  { %2135 = vmatpush1.msra.mxu0 %v3779_v50  ;;  %2198 = vmatprep.mubr.f32.mxu0 %v3443_v3  ;;  %v2615_v50 = vld [vmem:[%s4257_s4 + $0x8] sm:$0xff] }
 0x625   :  { %2206 = vmatpush1.msra.mxu1 %v3799_v54  ;;  %2269 = vmatprep.mubr.f32.mxu1 %v3443_v3 }
 0x626   :  { %3237 = vmatprep.subr.bf16.mxu0 %v3505_v9  ;;  %3269 = vmatprep.subr.bf16.mxu1 %v3492_v4  ;;  %v3439_v4 = vld [vmem:[%s4254_s1 + $0x8] sm:$0xff] }
 0x62b   :  { %2730 = vmatmul.mubr.msk.f32.vlgmr.msra.gmra.mrb[12].mxu0 %vm264_vm0, %v2729_v30  ;;  %2731 = vmatmul.mubr.msk.f32.vlgmr.msra.gmra.mrb[20].mxu1 %vm264_vm0, %v2729_v30 }
 0x62c   :  { %3239 = vmatpush1.bf16.msra.mxu0 %v3530_v17  ;;  %3271 = vmatpush1.bf16.msra.mxu1 %v3503_v8  ;;  %v3440_v8 = vld [vmem:[%s4254_s1 + $0x18] sm:$0xff] }
 0x62d   :  { %3241 = vmatprep.subr.bf16.mxu0 %v3544_v22  ;;  %3273 = vmatprep.subr.bf16.mxu1 %v3517_v13 }
 0x62e   :  { %2364 = vmatprep.mubr.f32.mxu0 %v3443_v3  ;;  %2435 = vmatprep.mubr.f32.mxu1 %v3443_v3 }
 0x630   :  { %3243 = vmatpush1.bf16.msra.mxu0 %v3558_v27  ;;  %3275 = vmatpush1.bf16.msra.mxu1 %v3532_v18 }
 0x631   :  { %3245 = vmatprep.subr.bf16.mxu0 %v3582_v35  ;;  %3277 = vmatprep.subr.bf16.mxu1 %v3556_v26 }
 0x634   :  { %3247 = vmatpush1.bf16.msra.mxu0 %v3606_v43  ;;  %3279 = vmatpush1.bf16.msra.mxu1 %v3580_v34 }
 0x635   :  { %3249 = vmatprep.subr.bf16.mxu0 %v3615_v46  ;;  %3281 = vmatprep.subr.bf16.mxu1 %v3594_v39 }
 0x638   :  { %3251 = vmatpush1.bf16.msra.mxu0 %v3642_v55  ;;  %3283 = vmatpush1.bf16.msra.mxu1 %v3624_v49 }
 0x639   :  { %3253 = vmatprep.subr.bf16.mxu0 %v3651_v58  ;;  %3285 = vmatprep.subr.bf16.mxu1 %v3633_v52 }
 0x63c   :  { %3255 = vmatpush1.bf16.msra.mxu0 %v3678_v5  ;;  %3287 = vmatpush1.bf16.msra.mxu1 %v3660_v61 }
 0x63d   :  { %3257 = vmatprep.subr.bf16.mxu0 %v3687_v10  ;;  %3289 = vmatprep.subr.bf16.mxu1 %v3669_v0 }
 0x640   :  { %3259 = vmatpush1.bf16.msra.mxu0 %v3714_v23  ;;  %3291 = vmatpush1.bf16.msra.mxu1 %v3696_v14 }
 0x641   :  { %3261 = vmatprep.subr.bf16.mxu0 %v3723_v28  ;;  %3293 = vmatprep.subr.bf16.mxu1 %v3705_v19 }
 0x644   :  { %3263 = vmatpush1.bf16.msra.mxu0 %v3750_v40  ;;  %3295 = vmatpush1.bf16.msra.mxu1 %v3732_v31  ;;  %v3441_v40 = vld [vmem:[%s4254_s1] sm:$0xff] }
 0x645   :  { %3265 = vmatprep.subr.bf16.mxu0 %v3753_v41  ;;  %3297 = vmatprep.subr.bf16.mxu1 %v3741_v36  ;;  %v3442_v41 = vld [vmem:[%s4254_s1 + $0x10] sm:$0xff] }
 0x648   :  { %3267 = vmatpush1.bf16.msra.mxu0 %v3771_v48  ;;  %3299 = vmatpush1.bf16.msra.mxu1 %v3762_v45  ;;  %v2732_v45 = vld [vmem:[%s4255_s0 + $0x38] sm:$0xff]  ;;  %v2614_v48 = vld [vmem:[%s4257_s4] sm:$0xff] }
 0x649   :  { %2445 = vmatprep.subr.mxu0 %v3439_v4  ;;  %2516 = vmatprep.subr.mxu1 %v3440_v8  ;;  %v3301_v54 = vpack.c.bf16 %v2615_v50, %v2614_v48 }
 0x6fe   :  { %v2200_v9 = vpop.f32.mrb[12].mxu0  ;;  %v2271_v13 = vpop.f32.mrb[20].mxu1 }
 0x6ff   :  { %v2276_v17 = vadd.f32 %v2200_v9, %v3843_v1  ;;  %v2202_v18 = vpop.f32.mrb[13].mxu0  ;;  %v2273_v22 = vpop.f32.mrb[21].mxu1  ;;  %v2278_v35 = vadd.f32 %v2271_v13, %v3848_v21 }
 0x700   :  { %v2277_v26 = vadd.f32 %v2202_v18, %v3845_v11  ;;  %v2279_v39 = vadd.f32 %v2273_v22, %v3852_v38 }
 0x701   :  { %v2280_v27 = vmul.f32 0.5, %v2276_v17 }
 0x702   :  { %v2284_v34 = vmul.f32 0.5, %v2277_v26  ;;  %v2289_v43 = vmul.f32 0.5, %v2279_v39 }
 0x703   :  { %3419 = vtanh.f32 %v2280_v27 }
 0x704   :  { %3421 = vtanh.f32 %v2284_v34 }
 0x705   :  { %3423 = vtanh.f32 %v2278_v35 }
 0x706   :  { %3425 = vtanh.f32 %v2289_v43 }
 0x70d   :  { %v3420_v46 = vpop.eup %3419 }
 0x70e   :  { %v3422_v49 = vpop.eup %3421  ;;  %v2282_v52 = vmul.f32 0.5, %v3420_v46 }
 0x70f   :  { %v2286_v55 = vmul.f32 0.5, %v3422_v49  ;;  %v3424_v61 = vpop.eup %3423 }
 0x710   :  { %v2283_v58 = vadd.f32 0.5, %v2282_v52  ;;  %v3426_v19 = vpop.eup %3425 }
 0x711   :  { %v2287_v0 = vadd.f32 0.5, %v2286_v55  ;;  %v2291_v23 = vmul.f32 0.5, %v3426_v19 }
 0x712   :  { %v2294_v5 = vmul.f32 %v3424_v61, %v2283_v58 }
 0x713   :  { %v2293_v10 = vmul.f32 %v2287_v0, %v4120_v37  ;;  %v2292_v28 = vadd.f32 0.5, %v2291_v23  ;;  %v3319_v37 = vpack.c.bf16 %v2627_v33, %v2626_v57 }
 0x715   :  { %v4177_v14 = vadd.f32 %v2294_v5, %v2293_v10 }
 0x717   :  { %3427 = vtanh.f32 %v4177_v14 }
 0x721   :  { %v3428_v31 = vpop.eup %3427 }
 0x722   :  { %v2297_v36 = vmul.f32 %v3428_v31, %v2292_v28 }
 0x724   :  { %2365 = vmatmul.mubr.f32.vlgmr.msra.gmra.mrb[14].mxu0 %v2297_v36  ;;  %2436 = vmatmul.mubr.f32.vlgmr.msra.gmra.mrb[22].mxu1 %v2297_v36 }
 0x725   :  { %2446 = vmatpush1.msra.mxu0 %v3441_v40  ;;  %2509 = vmatprep.mubr.f32.mxu0 %v3443_v3 }
 0x726   :  { %2517 = vmatpush1.msra.mxu1 %v3442_v41  ;;  %2580 = vmatprep.mubr.f32.mxu1 %v3443_v3 }
 0x727   :  { %3300 = vmatprep.subr.bf16.mxu0 %v3444_v12 }
 0x72c   :  { %2733 = vmatmul.mubr.msk.f32.vlgmr.msra.gmra.mrb[14].mxu0 %vm264_vm0, %v2732_v45  ;;  %2734 = vmatmul.mubr.msk.f32.vlgmr.msra.gmra.mrb[22].mxu1 %vm264_vm0, %v2732_v45 }
 0x72d   :  { %3302 = vmatpush3.bf16.msra.mxu0 %v3301_v54  ;;  %2785 = vmatprep.mubr.msk.f32.mxu0 %vm3445_vm1, %v3443_v3 }
 0x72e   :  { %3303 = vmatprep.subr.bf16.mxu0 %v3444_v12 }
 0x731   :  { %3305 = vmatpush3.bf16.msra.mxu0 %v3304_v63 }
 0x732   :  { %3306 = vmatprep.subr.bf16.mxu0 %v3444_v12 }
 0x735   :  { %3308 = vmatpush3.bf16.msra.mxu0 %v3307_v7 }
 0x736   :  { %3309 = vmatprep.subr.bf16.mxu0 %v3444_v12 }
 0x739   :  { %3311 = vmatpush3.bf16.msra.mxu0 %v3310_v32 }
 0x73a   :  { %3312 = vmatprep.subr.bf16.mxu0 %v3444_v12 }
 0x73d   :  { %3314 = vmatpush3.bf16.msra.mxu0 %v3313_v20 }
 0x73e   :  { %3315 = vmatprep.subr.bf16.mxu0 %v3444_v12 }
 0x741   :  { %3317 = vmatpush3.bf16.msra.mxu0 %v3316_v29 }
 0x742   :  { %3318 = vmatprep.subr.bf16.mxu0 %v3444_v12 }
 0x745   :  { %3320 = vmatpush3.bf16.msra.mxu0 %v3319_v37 }
 0x746   :  { %3321 = vmatprep.subr.bf16.mxu0 %v3444_v12 }
 0x749   :  { %3323 = vmatpush3.bf16.msra.mxu0 %v3322_v16 }
 0x7ff   :  { %v2511_v53 = vpop.f32.mrb[14].mxu0  ;;  %v2582_v56 = vpop.f32.mrb[22].mxu1 }
 0x800   :  { %v2587_v30 = vadd.f32 %v2511_v53, %v3843_v1  ;;  %v2513_v4 = vpop.f32.mrb[15].mxu0  ;;  %v2584_v8 = vpop.f32.mrb[23].mxu1  ;;  %v2589_v18 = vadd.f32 %v2582_v56, %v3848_v21 }
 0x801   :  { %v2588_v9 = vadd.f32 %v2513_v4, %v3845_v11  ;;  %v2590_v22 = vadd.f32 %v2584_v8, %v3852_v38  ;;  %v2735_v38 = vld [vmem:[%s4258_s5] ss:$0 sm:$0xff] }
 0x802   :  { %v2591_v13 = vmul.f32 0.5, %v2587_v30 }
 0x803   :  { %v2595_v17 = vmul.f32 0.5, %v2588_v9  ;;  %v2600_v26 = vmul.f32 0.5, %v2590_v22 }
 0x804   :  { %3429 = vtanh.f32 %v2591_v13 }
 0x805   :  { %3431 = vtanh.f32 %v2595_v17 }
 0x806   :  { %3433 = vtanh.f32 %v2589_v18 }
 0x807   :  { %3435 = vtanh.f32 %v2600_v26 }
 0x80e   :  { %v3430_v27 = vpop.eup %3429 }
 0x80f   :  { %v3432_v3 = vpop.eup %3431  ;;  %v2593_v34 = vmul.f32 0.5, %v3430_v27 }
 0x810   :  { %v2597_v35 = vmul.f32 0.5, %v3432_v3  ;;  %v3434_v39 = vpop.eup %3433 }
 0x811   :  { %v2594_v1 = vadd.f32 0.5, %v2593_v34  ;;  %v3436_v52 = vpop.eup %3435 }
 0x812   :  { %v2598_v43 = vadd.f32 0.5, %v2597_v35  ;;  %v2602_v21 = vmul.f32 0.5, %v3436_v52 }
 0x813   :  { %v2605_v46 = vmul.f32 %v3434_v39, %v2594_v1 }
 0x814   :  { %v2604_v11 = vmul.f32 %v2598_v43, %v4177_v14  ;;  %v2603_v55 = vadd.f32 0.5, %v2602_v21 }
 0x816   :  { %v2606_v49 = vadd.f32 %v2605_v46, %v2604_v11 }
 0x818   :  { %3437 = vtanh.f32 %v2606_v49 }
 0x822   :  { %v3438_v58 = vpop.eup %3437 }
 0x823   :  { %v2608_v61 = vmul.f32 %v3438_v58, %v2603_v55 }
 0x825   :  { %2786 = vmatmul.mubr.f32.vlgmr.msra.gmra.mrb[16].mxu0 %v2608_v61 }
 0x8f8   :  { %v2703_v0 = vpop.f32.mrb[16].mxu0 }
 0x8f9   :  { %v2704_v5 = vadd.f32 %v2735_v38, %v2703_v0  ;;  %v2787_v10 = vpop.f32.mrb[17].mxu0 }
 0x8fb   :  { %2707 = vst [vmem:[%s4259_s6] sm:$0xff] %v2704_v5 }

</bundles_post_ra>
